<compile_context>
chip_gen: v5e
topology: v5e:2x2
jax: 0.10.0
libtpu: 0.0.40
codegen_flags: <defaults>
</compile_context>

<pallas_src>
import math
import numpy as np
import jax
import jax.numpy as jnp
from jax import lax
from jax.experimental import pallas as pl
from jax.experimental.pallas import tpu as pltpu

# ----------------------------- model dims (small, synthetic) -----------------
B = 2            # batch (== reasoner_max_batch_size)
L = 8            # current sequence length
D = 32           # reasoner_hidden_dim
H = 4            # reasoner_num_heads
KVH = 2          # reasoner_num_kv_heads
HD = D // H      # reasoner_head_dim = 8
N_REP = H // KVH
QD = H * HD      # 32
KD = KVH * HD    # 16
MAX_POS = 16     # reasoner_max_position_embeddings
MULTIPLE_OF = 32
EPS = 1e-5       # reasoner_rms_norm_eps
ROPE_THETA = 10000.0
START_POS = 0
S = START_POS + L
BL = B * L

_ffn = 4 * D
_ffn = int(2 * _ffn / 3)
F = MULTIPLE_OF * ((_ffn + MULTIPLE_OF - 1) // MULTIPLE_OF)   # 96


# ----------------------------- fused Pallas kernel ----------------------------
def _rmsnorm(x, w):
    # x: (R, D), w: (1, D)
    var = jnp.mean(x * x, axis=-1, keepdims=True)
    return x * lax.rsqrt(var + EPS) * w


def fused_block_kernel(x_ref, anw_ref, fnw_ref,
                       wq_ref, wk_ref, wv_ref, wo_ref,
                       w1_ref, w2_ref, w3_ref,
                       rq_ref, rk_ref,
                       cosq_ref, sinq_ref, cosk_ref, sink_ref,
                       mask_ref, kc_in_ref, vc_in_ref,
                       out_ref, kc_out_ref, vc_out_ref,
                       attn_buf):
    x = x_ref[...]                                                        # (BL, D)

    # ---- RMSNorm + QKV projections on all B*L rows at once ----
    xn = _rmsnorm(x, anw_ref[...])
    xq = jnp.dot(xn, wq_ref[...], preferred_element_type=jnp.float32)    # (BL, QD)
    xk = jnp.dot(xn, wk_ref[...], preferred_element_type=jnp.float32)    # (BL, KD)
    xv = jnp.dot(xn, wv_ref[...], preferred_element_type=jnp.float32)    # (BL, KD)

    # ---- interleaved RoPE: out = x*cos + rot(x)*sin, pair swap/negate done as a
    #      constant +/-1 matrix so it stays a lane-friendly MXU op (MXU is idle). ----
    xq = xq * cosq_ref[...] + jnp.dot(xq, rq_ref[...],
                                      preferred_element_type=jnp.float32) * sinq_ref[...]
    xk = xk * cosk_ref[...] + jnp.dot(xk, rk_ref[...],
                                      preferred_element_type=jnp.float32) * sink_ref[...]

    # ---- KV-cache update, entirely in-kernel (no XLA dynamic_update_slice glue) ----
    kc_out_ref[...] = kc_in_ref[...]
    vc_out_ref[...] = vc_in_ref[...]
    for b in range(B):                                   # static, B = 2
        kc_out_ref[b, START_POS:START_POS + L, :] = xk[b * L:(b + 1) * L, :]
        vc_out_ref[b, START_POS:START_POS + L, :] = xv[b * L:(b + 1) * L, :]

    # ---- attention: static loop over batch x head, GQA sharing via h // N_REP ----
    scale = 1.0 / math.sqrt(HD)
    mask = mask_ref[...]                                  # (L, S)
    for b in range(B):
        keys = kc_out_ref[b, 0:S, :]                      # (S, KD)
        vals = vc_out_ref[b, 0:S, :]
        for h in range(H):                                # static, H = 4
            j = h // N_REP
            qh = xq[b * L:(b + 1) * L, h * HD:(h + 1) * HD]               # (L, HD)
            kh = keys[:, j * HD:(j + 1) * HD]                             # (S, HD)
            vh = vals[:, j * HD:(j + 1) * HD]                             # (S, HD)
            s = lax.dot_general(qh, kh, (((1,), (1,)), ((), ())),
                                preferred_element_type=jnp.float32) * scale
            s = s + mask
            m = jnp.max(s, axis=-1, keepdims=True)
            e = jnp.exp(s - m)
            # exact reciprocal keeps the 1e-4 check honest (approx=True is the perf knob)
            p = e * pl.reciprocal(jnp.sum(e, axis=-1, keepdims=True), approx=False)
            oh = jnp.dot(p, vh, preferred_element_type=jnp.float32)       # (L, HD)
            # write into the head's lane slice; one big (BL,QD)@(QD,D) out-proj later
            attn_buf[b * L:(b + 1) * L, h * HD:(h + 1) * HD] = oh

    # ---- output projection + residual (single matmul with the original wo) ----
    h_res = x + jnp.dot(attn_buf[...], wo_ref[...], preferred_element_type=jnp.float32)

    # ---- RMSNorm + SwiGLU FFN + residual ----
    hn = _rmsnorm(h_res, fnw_ref[...])
    a = jnp.dot(hn, w1_ref[...], preferred_element_type=jnp.float32)      # (BL, F)
    g = a * (1.0 / (1.0 + jnp.exp(-a)))                                   # SiLU
    u = jnp.dot(hn, w3_ref[...], preferred_element_type=jnp.float32)      # (BL, F)
    out_ref[...] = h_res + jnp.dot(g * u, w2_ref[...],
                                   preferred_element_type=jnp.float32)


# ----------------------------- one-time constants ------------------------------
def _pair_rot_matrix(n):
    """Constant matrix R s.t. (x @ R)[2i] = -x[2i+1], (x @ R)[2i+1] = x[2i]."""
    r = np.zeros((n, n), np.float32)
    for i in range(n // 2):
        r[2 * i, 2 * i + 1] = 1.0
        r[2 * i + 1, 2 * i] = -1.0
    return jnp.asarray(r)


def _expand_rope_flat(cos, sin, n_heads, batch):
    # cos/sin: (L, HD//2) -> (B*L, n_heads*HD) with pairwise duplication per head
    # and batch tiling to match the flattened (B*L, .) activation layout.
    ce = jnp.tile(jnp.repeat(cos, 2, axis=-1), (batch, n_heads))
    se = jnp.tile(jnp.repeat(sin, 2, axis=-1), (batch, n_heads))
    return ce, se


# ----------------------------- wrapper ----------------------------------------
def reasoner_block_forward(x, params, cache_k, cache_v, mask, rope_consts):
    (attn_nw, wq, wk, wv, wo, ffn_nw, w1, w2, w3) = params
    (cosq, sinq, cosk, sink, rq, rk) = rope_consts

    # metadata-only reshapes (contiguous): (B,L,D)->(B*L,D), cache (KVH,HD)->(KD)
    x2 = x.reshape(BL, D)
    kc = cache_k[:B].reshape(B, MAX_POS, KD)
    vc = cache_v[:B].reshape(B, MAX_POS, KD)

    # single fused pallas_call, no grid: everything fits in VMEM at these sizes,
    # so any grid axis or extra pipelining would only add per-step overhead.
    out2, kc_new, vc_new = pl.pallas_call(
        fused_block_kernel,
        out_shape=(jax.ShapeDtypeStruct((BL, D), jnp.float32),
                   jax.ShapeDtypeStruct((B, MAX_POS, KD), jnp.float32),
                   jax.ShapeDtypeStruct((B, MAX_POS, KD), jnp.float32)),
        scratch_shapes=[pltpu.VMEM((BL, QD), jnp.float32)],
    )(x2, attn_nw, ffn_nw, wq, wk, wv, wo, w1, w2, w3,
      rq, rk, cosq, sinq, cosk, sink, mask, kc, vc)

    out = out2.reshape(B, L, D)
    new_ck = kc_new.reshape(B, MAX_POS, KVH, HD)
    new_cv = vc_new.reshape(B, MAX_POS, KVH, HD)
    # TODO(synk): the nn.Module's in-place KV-cache mutation is expressed
    # functionally (new caches returned); input_output_aliases on the cache
    # buffers would make the write truly in-place once MAX_POS is realistic.
    return out, new_ck, new_cv


# ----------------------------- pure-JAX reference ------------------------------
def reference_forward(x, params, cache_k, cache_v, mask, cos, sin):
    (attn_nw, wq, wk, wv, wo, ffn_nw, w1, w2, w3) = params

    def rms(t, w):
        return t * lax.rsqrt(jnp.mean(t * t, -1, keepdims=True) + EPS) * w

    def rope(t, c, s):  # t: (B,L,nh,Hd), c/s: (L, Hd//2)
        t2 = t.reshape(*t.shape[:-1], -1, 2)
        te, to = t2[..., 0], t2[..., 1]
        c = c[None, :, None, :]
        s = s[None, :, None, :]
        return jnp.stack([te * c - to * s, te * s + to * c], -1).reshape(t.shape)

    xn = rms(x, attn_nw)
    xq = (xn @ wq).reshape(B, L, H, HD)
    xk = (xn @ wk).reshape(B, L, KVH, HD)
    xv = (xn @ wv).reshape(B, L, KVH, HD)
    xq = rope(xq, cos, sin)
    xk = rope(xk, cos, sin)
    ck = lax.dynamic_update_slice(cache_k[:B], xk, (0, START_POS, 0, 0))
    cv = lax.dynamic_update_slice(cache_v[:B], xv, (0, START_POS, 0, 0))
    keys = jnp.repeat(ck[:, :S], N_REP, 2).transpose(0, 2, 1, 3)
    vals = jnp.repeat(cv[:, :S], N_REP, 2).transpose(0, 2, 1, 3)
    q = xq.transpose(0, 2, 1, 3)
    scores = jnp.einsum('bhld,bhsd->bhls', q, keys) / math.sqrt(HD) + mask
    p = jax.nn.softmax(scores, -1)
    o = jnp.einsum('bhls,bhsd->bhld', p, vals).transpose(0, 2, 1, 3).reshape(B, L, QD)
    h = x + o @ wo
    hn = rms(h, ffn_nw)
    out = h + (jax.nn.silu(hn @ w1) * (hn @ w3)) @ w2
    return out, ck, cv


# ----------------------------- main --------------------------------------------
if __name__ == "__main__":
    key = jax.random.PRNGKey(0)
    ks = jax.random.split(key, 8)

    def init(k, shape):
        return jax.random.normal(k, shape, jnp.float32) * 0.05

    attn_nw = jnp.ones((1, D), jnp.float32)
    ffn_nw = jnp.ones((1, D), jnp.float32)
    wq = init(ks[0], (D, QD))
    wk = init(ks[1], (D, KD))
    wv = init(ks[2], (D, KD))
    wo = init(ks[3], (QD, D))
    w1 = init(ks[4], (D, F))
    w2 = init(ks[5], (F, D))
    w3 = init(ks[6], (D, F))
    params = (attn_nw, wq, wk, wv, wo, ffn_nw, w1, w2, w3)

    x = jax.random.normal(ks[7], (B, L, D), jnp.float32)
    cache_k = jnp.zeros((B, MAX_POS, KVH, HD), jnp.float32)
    cache_v = jnp.zeros((B, MAX_POS, KVH, HD), jnp.float32)

    # rotary tables (freqs_cis equivalent: cos/sin of shape (L, Hd//2))
    inv_freq = 1.0 / (ROPE_THETA ** (jnp.arange(0, HD, 2, dtype=jnp.float32) / HD))
    t = jnp.arange(START_POS, START_POS + L, dtype=jnp.float32)
    angles = jnp.outer(t, inv_freq)                         # (L, Hd//2)
    cos, sin = jnp.cos(angles), jnp.sin(angles)

    # one-time expanded / flattened RoPE tables + pair-rotation matrices
    cosq, sinq = _expand_rope_flat(cos, sin, H, B)          # (B*L, QD)
    cosk, sink = _expand_rope_flat(cos, sin, KVH, B)        # (B*L, KD)
    rope_consts = (cosq, sinq, cosk, sink, _pair_rot_matrix(QD), _pair_rot_matrix(KD))

    # causal mask (L, S) as in llama-style decoding with start_pos prefix
    causal = jnp.triu(jnp.full((L, L), -1e30, jnp.float32), k=1)
    mask = jnp.concatenate([jnp.zeros((L, START_POS), jnp.float32), causal], axis=1)

    out, new_ck, new_cv = reasoner_block_forward(x, params, cache_k, cache_v,
                                                 mask, rope_consts)
    out = jax.block_until_ready(out)

    ref_out, ref_ck, ref_cv = reference_forward(x, params, cache_k, cache_v,
                                                mask, cos, sin)
    ref_out = jax.block_until_ready(ref_out)
    np.testing.assert_allclose(np.asarray(out), np.asarray(ref_out), rtol=1e-4, atol=1e-4)
    np.testing.assert_allclose(np.asarray(new_ck), np.asarray(ref_ck), rtol=1e-4, atol=1e-4)
    np.testing.assert_allclose(np.asarray(new_cv), np.asarray(ref_cv), rtol=1e-4, atol=1e-4)

    print("KERNEL_OK")
</pallas_src>

<mosaic_0001>
module attributes {stable_mosaic.version = 11 : i64} {
  func.func @fused_block_kernel(%arg0: memref<16x32xf32, #tpu.memory_space<vmem>>, %arg1: memref<1x32xf32, #tpu.memory_space<vmem>>, %arg2: memref<1x32xf32, #tpu.memory_space<vmem>>, %arg3: memref<32x32xf32, #tpu.memory_space<vmem>>, %arg4: memref<32x16xf32, #tpu.memory_space<vmem>>, %arg5: memref<32x16xf32, #tpu.memory_space<vmem>>, %arg6: memref<32x32xf32, #tpu.memory_space<vmem>>, %arg7: memref<32x96xf32, #tpu.memory_space<vmem>>, %arg8: memref<96x32xf32, #tpu.memory_space<vmem>>, %arg9: memref<32x96xf32, #tpu.memory_space<vmem>>, %arg10: memref<32x32xf32, #tpu.memory_space<vmem>>, %arg11: memref<16x16xf32, #tpu.memory_space<vmem>>, %arg12: memref<16x32xf32, #tpu.memory_space<vmem>>, %arg13: memref<16x32xf32, #tpu.memory_space<vmem>>, %arg14: memref<16x16xf32, #tpu.memory_space<vmem>>, %arg15: memref<16x16xf32, #tpu.memory_space<vmem>>, %arg16: memref<8x8xf32, #tpu.memory_space<vmem>>, %arg17: memref<2x16x16xf32, #tpu.memory_space<vmem>>, %arg18: memref<2x16x16xf32, #tpu.memory_space<vmem>>, %arg19: memref<16x32xf32, #tpu.memory_space<vmem>>, %arg20: memref<2x16x16xf32, #tpu.memory_space<vmem>>, %arg21: memref<2x16x16xf32, #tpu.memory_space<vmem>>, %arg22: memref<16x32xf32, #tpu.memory_space<vmem>>) attributes {dimension_semantics = [], scalar_prefetch = 0 : i64, scratch_operands = 1 : i64, tpu.core_type = #tpu.core_type<tc>} {
    %c0 = arith.constant 0 : index
    %c0_0 = arith.constant 0 : index
    %0 = vector.load %arg0[%c0, %c0_0] : memref<16x32xf32, #tpu.memory_space<vmem>>, vector<16x32xf32>
    %c0_1 = arith.constant 0 : index
    %c0_2 = arith.constant 0 : index
    %1 = vector.load %arg1[%c0_1, %c0_2] : memref<1x32xf32, #tpu.memory_space<vmem>>, vector<1x32xf32>
    %2 = arith.mulf %0, %0 : vector<16x32xf32>
    %cst = arith.constant dense<0.000000e+00> : vector<16xf32>
    %3 = vector.multi_reduction <add>, %2, %cst [1] : vector<16x32xf32> to vector<16xf32>
    %4 = vector.shape_cast %3 : vector<16xf32> to vector<16x1xf32>
    %cst_3 = arith.constant 3.200000e+01 : f32
    %5 = vector.broadcast %cst_3 : f32 to vector<16x1xf32>
    %6 = arith.divf %4, %5 : vector<16x1xf32>
    %cst_4 = arith.constant 9.99999974E-6 : f32
    %7 = vector.broadcast %cst_4 : f32 to vector<16x1xf32>
    %8 = arith.addf %6, %7 : vector<16x1xf32>
    %9 = math.rsqrt %8 : vector<16x1xf32>
    %10 = vector.broadcast %9 : vector<16x1xf32> to vector<16x32xf32>
    %11 = arith.mulf %0, %10 : vector<16x32xf32>
    %12 = vector.broadcast %1 : vector<1x32xf32> to vector<16x32xf32>
    %13 = arith.mulf %11, %12 : vector<16x32xf32>
    %c0_5 = arith.constant 0 : index
    %c0_6 = arith.constant 0 : index
    %14 = vector.load %arg3[%c0_5, %c0_6] : memref<32x32xf32, #tpu.memory_space<vmem>>, vector<32x32xf32>
    %cst_7 = arith.constant dense<0.000000e+00> : vector<16x32xf32>
    %15 = tpu.matmul %13, %14, %cst_7 {dimension_numbers = #tpu.dot_dimension_numbers<[1], [0], [0], [1], [0, 0, 1, 1], [], []>} : vector<16x32xf32>, vector<32x32xf32>, vector<16x32xf32> -> vector<16x32xf32>
    %c0_8 = arith.constant 0 : index
    %c0_9 = arith.constant 0 : index
    %16 = vector.load %arg4[%c0_8, %c0_9] : memref<32x16xf32, #tpu.memory_space<vmem>>, vector<32x16xf32>
    %cst_10 = arith.constant dense<0.000000e+00> : vector<16x16xf32>
    %17 = tpu.matmul %13, %16, %cst_10 {dimension_numbers = #tpu.dot_dimension_numbers<[1], [0], [0], [1], [0, 0, 1, 1], [], []>} : vector<16x32xf32>, vector<32x16xf32>, vector<16x16xf32> -> vector<16x16xf32>
    %c0_11 = arith.constant 0 : index
    %c0_12 = arith.constant 0 : index
    %18 = vector.load %arg5[%c0_11, %c0_12] : memref<32x16xf32, #tpu.memory_space<vmem>>, vector<32x16xf32>
    %cst_13 = arith.constant dense<0.000000e+00> : vector<16x16xf32>
    %19 = tpu.matmul %13, %18, %cst_13 {dimension_numbers = #tpu.dot_dimension_numbers<[1], [0], [0], [1], [0, 0, 1, 1], [], []>} : vector<16x32xf32>, vector<32x16xf32>, vector<16x16xf32> -> vector<16x16xf32>
    %c0_14 = arith.constant 0 : index
    %c0_15 = arith.constant 0 : index
    %20 = vector.load %arg12[%c0_14, %c0_15] : memref<16x32xf32, #tpu.memory_space<vmem>>, vector<16x32xf32>
    %21 = arith.mulf %15, %20 : vector<16x32xf32>
    %c0_16 = arith.constant 0 : index
    %c0_17 = arith.constant 0 : index
    %22 = vector.load %arg10[%c0_16, %c0_17] : memref<32x32xf32, #tpu.memory_space<vmem>>, vector<32x32xf32>
    %cst_18 = arith.constant dense<0.000000e+00> : vector<16x32xf32>
    %23 = tpu.matmul %15, %22, %cst_18 {dimension_numbers = #tpu.dot_dimension_numbers<[1], [0], [0], [1], [0, 0, 1, 1], [], []>} : vector<16x32xf32>, vector<32x32xf32>, vector<16x32xf32> -> vector<16x32xf32>
    %c0_19 = arith.constant 0 : index
    %c0_20 = arith.constant 0 : index
    %24 = vector.load %arg13[%c0_19, %c0_20] : memref<16x32xf32, #tpu.memory_space<vmem>>, vector<16x32xf32>
    %25 = arith.mulf %23, %24 : vector<16x32xf32>
    %26 = arith.addf %21, %25 : vector<16x32xf32>
    %c0_21 = arith.constant 0 : index
    %c0_22 = arith.constant 0 : index
    %27 = vector.load %arg14[%c0_21, %c0_22] : memref<16x16xf32, #tpu.memory_space<vmem>>, vector<16x16xf32>
    %28 = arith.mulf %17, %27 : vector<16x16xf32>
    %c0_23 = arith.constant 0 : index
    %c0_24 = arith.constant 0 : index
    %29 = vector.load %arg11[%c0_23, %c0_24] : memref<16x16xf32, #tpu.memory_space<vmem>>, vector<16x16xf32>
    %cst_25 = arith.constant dense<0.000000e+00> : vector<16x16xf32>
    %30 = tpu.matmul %17, %29, %cst_25 {dimension_numbers = #tpu.dot_dimension_numbers<[1], [0], [0], [1], [0, 0, 1, 1], [], []>} : vector<16x16xf32>, vector<16x16xf32>, vector<16x16xf32> -> vector<16x16xf32>
    %c0_26 = arith.constant 0 : index
    %c0_27 = arith.constant 0 : index
    %31 = vector.load %arg15[%c0_26, %c0_27] : memref<16x16xf32, #tpu.memory_space<vmem>>, vector<16x16xf32>
    %32 = arith.mulf %30, %31 : vector<16x16xf32>
    %33 = arith.addf %28, %32 : vector<16x16xf32>
    %c0_28 = arith.constant 0 : index
    %c0_29 = arith.constant 0 : index
    %c0_30 = arith.constant 0 : index
    %34 = vector.load %arg17[%c0_28, %c0_29, %c0_30] : memref<2x16x16xf32, #tpu.memory_space<vmem>>, vector<2x16x16xf32>
    %c0_31 = arith.constant 0 : index
    %c0_32 = arith.constant 0 : index
    %c0_33 = arith.constant 0 : index
    %35 = vector.load %arg20[%c0_31, %c0_32, %c0_33] : memref<2x16x16xf32, #tpu.memory_space<vmem>>, vector<2x16x16xf32>
    tpu.vector_store %arg20[%c0_31, %c0_32, %c0_33], %34 {strides = array<i32>} : memref<2x16x16xf32, #tpu.memory_space<vmem>>, vector<2x16x16xf32>,
    %c0_34 = arith.constant 0 : index
    %c0_35 = arith.constant 0 : index
    %c0_36 = arith.constant 0 : index
    %36 = vector.load %arg18[%c0_34, %c0_35, %c0_36] : memref<2x16x16xf32, #tpu.memory_space<vmem>>, vector<2x16x16xf32>
    %c0_37 = arith.constant 0 : index
    %c0_38 = arith.constant 0 : index
    %c0_39 = arith.constant 0 : index
    %37 = vector.load %arg21[%c0_37, %c0_38, %c0_39] : memref<2x16x16xf32, #tpu.memory_space<vmem>>, vector<2x16x16xf32>
    tpu.vector_store %arg21[%c0_37, %c0_38, %c0_39], %36 {strides = array<i32>} : memref<2x16x16xf32, #tpu.memory_space<vmem>>, vector<2x16x16xf32>,
    %38 = vector.extract_strided_slice %33 {offsets = [0, 0], sizes = [8, 16], strides = [1, 1]} : vector<16x16xf32> to vector<8x16xf32>
    %c0_40 = arith.constant 0 : index
    %c0_41 = arith.constant 0 : index
    %c0_42 = arith.constant 0 : index
    %39 = vector.load %arg20[%c0_40, %c0_41, %c0_42] : memref<2x16x16xf32, #tpu.memory_space<vmem>>, vector<1x8x16xf32>
    %40 = vector.shape_cast %39 : vector<1x8x16xf32> to vector<8x16xf32>
    %41 = vector.shape_cast %38 : vector<8x16xf32> to vector<1x8x16xf32>
    tpu.vector_store %arg20[%c0_40, %c0_41, %c0_42], %41 {strides = array<i32>} : memref<2x16x16xf32, #tpu.memory_space<vmem>>, vector<1x8x16xf32>,
    %42 = vector.extract_strided_slice %19 {offsets = [0, 0], sizes = [8, 16], strides = [1, 1]} : vector<16x16xf32> to vector<8x16xf32>
    %c0_43 = arith.constant 0 : index
    %c0_44 = arith.constant 0 : index
    %c0_45 = arith.constant 0 : index
    %43 = vector.load %arg21[%c0_43, %c0_44, %c0_45] : memref<2x16x16xf32, #tpu.memory_space<vmem>>, vector<1x8x16xf32>
    %44 = vector.shape_cast %43 : vector<1x8x16xf32> to vector<8x16xf32>
    %45 = vector.shape_cast %42 : vector<8x16xf32> to vector<1x8x16xf32>
    tpu.vector_store %arg21[%c0_43, %c0_44, %c0_45], %45 {strides = array<i32>} : memref<2x16x16xf32, #tpu.memory_space<vmem>>, vector<1x8x16xf32>,
    %46 = vector.extract_strided_slice %33 {offsets = [8, 0], sizes = [8, 16], strides = [1, 1]} : vector<16x16xf32> to vector<8x16xf32>
    %c1 = arith.constant 1 : index
    %c0_46 = arith.constant 0 : index
    %c0_47 = arith.constant 0 : index
    %47 = vector.load %arg20[%c1, %c0_46, %c0_47] : memref<2x16x16xf32, #tpu.memory_space<vmem>>, vector<1x8x16xf32>
    %48 = vector.shape_cast %47 : vector<1x8x16xf32> to vector<8x16xf32>
    %49 = vector.shape_cast %46 : vector<8x16xf32> to vector<1x8x16xf32>
    tpu.vector_store %arg20[%c1, %c0_46, %c0_47], %49 {strides = array<i32>} : memref<2x16x16xf32, #tpu.memory_space<vmem>>, vector<1x8x16xf32>,
    %50 = vector.extract_strided_slice %19 {offsets = [8, 0], sizes = [8, 16], strides = [1, 1]} : vector<16x16xf32> to vector<8x16xf32>
    %c1_48 = arith.constant 1 : index
    %c0_49 = arith.constant 0 : index
    %c0_50 = arith.constant 0 : index
    %51 = vector.load %arg21[%c1_48, %c0_49, %c0_50] : memref<2x16x16xf32, #tpu.memory_space<vmem>>, vector<1x8x16xf32>
    %52 = vector.shape_cast %51 : vector<1x8x16xf32> to vector<8x16xf32>
    %53 = vector.shape_cast %50 : vector<8x16xf32> to vector<1x8x16xf32>
    tpu.vector_store %arg21[%c1_48, %c0_49, %c0_50], %53 {strides = array<i32>} : memref<2x16x16xf32, #tpu.memory_space<vmem>>, vector<1x8x16xf32>,
    %c0_51 = arith.constant 0 : index
    %c0_52 = arith.constant 0 : index
    %54 = vector.load %arg16[%c0_51, %c0_52] : memref<8x8xf32, #tpu.memory_space<vmem>>, vector<8x8xf32>
    %c0_53 = arith.constant 0 : index
    %c0_54 = arith.constant 0 : index
    %c0_55 = arith.constant 0 : index
    %55 = vector.load %arg20[%c0_53, %c0_54, %c0_55] : memref<2x16x16xf32, #tpu.memory_space<vmem>>, vector<1x8x16xf32>
    %56 = vector.shape_cast %55 : vector<1x8x16xf32> to vector<8x16xf32>
    %c0_56 = arith.constant 0 : index
    %c0_57 = arith.constant 0 : index
    %c0_58 = arith.constant 0 : index
    %57 = vector.load %arg21[%c0_56, %c0_57, %c0_58] : memref<2x16x16xf32, #tpu.memory_space<vmem>>, vector<1x8x16xf32>
    %58 = vector.shape_cast %57 : vector<1x8x16xf32> to vector<8x16xf32>
    %59 = vector.extract_strided_slice %26 {offsets = [0, 0], sizes = [8, 8], strides = [1, 1]} : vector<16x32xf32> to vector<8x8xf32>
    %60 = vector.extract_strided_slice %56 {offsets = [0, 0], sizes = [8, 8], strides = [1, 1]} : vector<8x16xf32> to vector<8x8xf32>
    %61 = vector.extract_strided_slice %58 {offsets = [0, 0], sizes = [8, 8], strides = [1, 1]} : vector<8x16xf32> to vector<8x8xf32>
    %cst_59 = arith.constant dense<0.000000e+00> : vector<8x8xf32>
    %62 = tpu.matmul %59, %60, %cst_59 {dimension_numbers = #tpu.dot_dimension_numbers<[1], [1], [0], [0], [0, 0, 1, 0], [], []>} : vector<8x8xf32>, vector<8x8xf32>, vector<8x8xf32> -> vector<8x8xf32>
    %cst_60 = arith.constant 0.353553385 : f32
    %63 = vector.broadcast %cst_60 : f32 to vector<8x8xf32>
    %64 = arith.mulf %62, %63 : vector<8x8xf32>
    %65 = arith.addf %64, %54 : vector<8x8xf32>
    %cst_61 = arith.constant dense<0xFF800000> : vector<8xf32>
    %66 = vector.multi_reduction <maximumf>, %65, %cst_61 [1] : vector<8x8xf32> to vector<8xf32>
    %67 = vector.shape_cast %66 : vector<8xf32> to vector<8x1xf32>
    %68 = vector.broadcast %67 : vector<8x1xf32> to vector<8x8xf32>
    %69 = arith.subf %65, %68 : vector<8x8xf32>
    %70 = math.exp %69 : vector<8x8xf32>
    %cst_62 = arith.constant dense<0.000000e+00> : vector<8xf32>
    %71 = vector.multi_reduction <add>, %70, %cst_62 [1] : vector<8x8xf32> to vector<8xf32>
    %72 = vector.shape_cast %71 : vector<8xf32> to vector<8x1xf32>
    %73 = tpu.reciprocal %72 : vector<8x1xf32> -> vector<8x1xf32>
    %74 = vector.broadcast %73 : vector<8x1xf32> to vector<8x8xf32>
    %75 = arith.mulf %70, %74 : vector<8x8xf32>
    %cst_63 = arith.constant dense<0.000000e+00> : vector<8x8xf32>
    %76 = tpu.matmul %75, %61, %cst_63 {dimension_numbers = #tpu.dot_dimension_numbers<[1], [0], [0], [1], [0, 0, 1, 1], [], []>} : vector<8x8xf32>, vector<8x8xf32>, vector<8x8xf32> -> vector<8x8xf32>
    %c0_64 = arith.constant 0 : index
    %c0_65 = arith.constant 0 : index
    %77 = vector.load %arg22[%c0_64, %c0_65] : memref<16x32xf32, #tpu.memory_space<vmem>>, vector<8x8xf32>
    tpu.vector_store %arg22[%c0_64, %c0_65], %76 {strides = array<i32>} : memref<16x32xf32, #tpu.memory_space<vmem>>, vector<8x8xf32>,
    %78 = vector.extract_strided_slice %26 {offsets = [0, 8], sizes = [8, 8], strides = [1, 1]} : vector<16x32xf32> to vector<8x8xf32>
    %79 = vector.extract_strided_slice %56 {offsets = [0, 0], sizes = [8, 8], strides = [1, 1]} : vector<8x16xf32> to vector<8x8xf32>
    %80 = vector.extract_strided_slice %58 {offsets = [0, 0], sizes = [8, 8], strides = [1, 1]} : vector<8x16xf32> to vector<8x8xf32>
    %cst_66 = arith.constant dense<0.000000e+00> : vector<8x8xf32>
    %81 = tpu.matmul %78, %79, %cst_66 {dimension_numbers = #tpu.dot_dimension_numbers<[1], [1], [0], [0], [0, 0, 1, 0], [], []>} : vector<8x8xf32>, vector<8x8xf32>, vector<8x8xf32> -> vector<8x8xf32>
    %cst_67 = arith.constant 0.353553385 : f32
    %82 = vector.broadcast %cst_67 : f32 to vector<8x8xf32>
    %83 = arith.mulf %81, %82 : vector<8x8xf32>
    %84 = arith.addf %83, %54 : vector<8x8xf32>
    %cst_68 = arith.constant dense<0xFF800000> : vector<8xf32>
    %85 = vector.multi_reduction <maximumf>, %84, %cst_68 [1] : vector<8x8xf32> to vector<8xf32>
    %86 = vector.shape_cast %85 : vector<8xf32> to vector<8x1xf32>
    %87 = vector.broadcast %86 : vector<8x1xf32> to vector<8x8xf32>
    %88 = arith.subf %84, %87 : vector<8x8xf32>
    %89 = math.exp %88 : vector<8x8xf32>
    %cst_69 = arith.constant dense<0.000000e+00> : vector<8xf32>
    %90 = vector.multi_reduction <add>, %89, %cst_69 [1] : vector<8x8xf32> to vector<8xf32>
    %91 = vector.shape_cast %90 : vector<8xf32> to vector<8x1xf32>
    %92 = tpu.reciprocal %91 : vector<8x1xf32> -> vector<8x1xf32>
    %93 = vector.broadcast %92 : vector<8x1xf32> to vector<8x8xf32>
    %94 = arith.mulf %89, %93 : vector<8x8xf32>
    %cst_70 = arith.constant dense<0.000000e+00> : vector<8x8xf32>
    %95 = tpu.matmul %94, %80, %cst_70 {dimension_numbers = #tpu.dot_dimension_numbers<[1], [0], [0], [1], [0, 0, 1, 1], [], []>} : vector<8x8xf32>, vector<8x8xf32>, vector<8x8xf32> -> vector<8x8xf32>
    %c0_71 = arith.constant 0 : index
    %c8 = arith.constant 8 : index
    %96 = vector.load %arg22[%c0_71, %c8] : memref<16x32xf32, #tpu.memory_space<vmem>>, vector<8x8xf32>
    tpu.vector_store %arg22[%c0_71, %c8], %95 {strides = array<i32>} : memref<16x32xf32, #tpu.memory_space<vmem>>, vector<8x8xf32>,
    %97 = vector.extract_strided_slice %26 {offsets = [0, 16], sizes = [8, 8], strides = [1, 1]} : vector<16x32xf32> to vector<8x8xf32>
    %98 = vector.extract_strided_slice %56 {offsets = [0, 8], sizes = [8, 8], strides = [1, 1]} : vector<8x16xf32> to vector<8x8xf32>
    %99 = vector.extract_strided_slice %58 {offsets = [0, 8], sizes = [8, 8], strides = [1, 1]} : vector<8x16xf32> to vector<8x8xf32>
    %cst_72 = arith.constant dense<0.000000e+00> : vector<8x8xf32>
    %100 = tpu.matmul %97, %98, %cst_72 {dimension_numbers = #tpu.dot_dimension_numbers<[1], [1], [0], [0], [0, 0, 1, 0], [], []>} : vector<8x8xf32>, vector<8x8xf32>, vector<8x8xf32> -> vector<8x8xf32>
    %cst_73 = arith.constant 0.353553385 : f32
    %101 = vector.broadcast %cst_73 : f32 to vector<8x8xf32>
    %102 = arith.mulf %100, %101 : vector<8x8xf32>
    %103 = arith.addf %102, %54 : vector<8x8xf32>
    %cst_74 = arith.constant dense<0xFF800000> : vector<8xf32>
    %104 = vector.multi_reduction <maximumf>, %103, %cst_74 [1] : vector<8x8xf32> to vector<8xf32>
    %105 = vector.shape_cast %104 : vector<8xf32> to vector<8x1xf32>
    %106 = vector.broadcast %105 : vector<8x1xf32> to vector<8x8xf32>
    %107 = arith.subf %103, %106 : vector<8x8xf32>
    %108 = math.exp %107 : vector<8x8xf32>
    %cst_75 = arith.constant dense<0.000000e+00> : vector<8xf32>
    %109 = vector.multi_reduction <add>, %108, %cst_75 [1] : vector<8x8xf32> to vector<8xf32>
    %110 = vector.shape_cast %109 : vector<8xf32> to vector<8x1xf32>
    %111 = tpu.reciprocal %110 : vector<8x1xf32> -> vector<8x1xf32>
    %112 = vector.broadcast %111 : vector<8x1xf32> to vector<8x8xf32>
    %113 = arith.mulf %108, %112 : vector<8x8xf32>
    %cst_76 = arith.constant dense<0.000000e+00> : vector<8x8xf32>
    %114 = tpu.matmul %113, %99, %cst_76 {dimension_numbers = #tpu.dot_dimension_numbers<[1], [0], [0], [1], [0, 0, 1, 1], [], []>} : vector<8x8xf32>, vector<8x8xf32>, vector<8x8xf32> -> vector<8x8xf32>
    %c0_77 = arith.constant 0 : index
    %c16 = arith.constant 16 : index
    %115 = vector.load %arg22[%c0_77, %c16] : memref<16x32xf32, #tpu.memory_space<vmem>>, vector<8x8xf32>
    tpu.vector_store %arg22[%c0_77, %c16], %114 {strides = array<i32>} : memref<16x32xf32, #tpu.memory_space<vmem>>, vector<8x8xf32>,
    %116 = vector.extract_strided_slice %26 {offsets = [0, 24], sizes = [8, 8], strides = [1, 1]} : vector<16x32xf32> to vector<8x8xf32>
    %117 = vector.extract_strided_slice %56 {offsets = [0, 8], sizes = [8, 8], strides = [1, 1]} : vector<8x16xf32> to vector<8x8xf32>
    %118 = vector.extract_strided_slice %58 {offsets = [0, 8], sizes = [8, 8], strides = [1, 1]} : vector<8x16xf32> to vector<8x8xf32>
    %cst_78 = arith.constant dense<0.000000e+00> : vector<8x8xf32>
    %119 = tpu.matmul %116, %117, %cst_78 {dimension_numbers = #tpu.dot_dimension_numbers<[1], [1], [0], [0], [0, 0, 1, 0], [], []>} : vector<8x8xf32>, vector<8x8xf32>, vector<8x8xf32> -> vector<8x8xf32>
    %cst_79 = arith.constant 0.353553385 : f32
    %120 = vector.broadcast %cst_79 : f32 to vector<8x8xf32>
    %121 = arith.mulf %119, %120 : vector<8x8xf32>
    %122 = arith.addf %121, %54 : vector<8x8xf32>
    %cst_80 = arith.constant dense<0xFF800000> : vector<8xf32>
    %123 = vector.multi_reduction <maximumf>, %122, %cst_80 [1] : vector<8x8xf32> to vector<8xf32>
    %124 = vector.shape_cast %123 : vector<8xf32> to vector<8x1xf32>
    %125 = vector.broadcast %124 : vector<8x1xf32> to vector<8x8xf32>
    %126 = arith.subf %122, %125 : vector<8x8xf32>
    %127 = math.exp %126 : vector<8x8xf32>
    %cst_81 = arith.constant dense<0.000000e+00> : vector<8xf32>
    %128 = vector.multi_reduction <add>, %127, %cst_81 [1] : vector<8x8xf32> to vector<8xf32>
    %129 = vector.shape_cast %128 : vector<8xf32> to vector<8x1xf32>
    %130 = tpu.reciprocal %129 : vector<8x1xf32> -> vector<8x1xf32>
    %131 = vector.broadcast %130 : vector<8x1xf32> to vector<8x8xf32>
    %132 = arith.mulf %127, %131 : vector<8x8xf32>
    %cst_82 = arith.constant dense<0.000000e+00> : vector<8x8xf32>
    %133 = tpu.matmul %132, %118, %cst_82 {dimension_numbers = #tpu.dot_dimension_numbers<[1], [0], [0], [1], [0, 0, 1, 1], [], []>} : vector<8x8xf32>, vector<8x8xf32>, vector<8x8xf32> -> vector<8x8xf32>
    %c0_83 = arith.constant 0 : index
    %c24 = arith.constant 24 : index
    %134 = vector.load %arg22[%c0_83, %c24] : memref<16x32xf32, #tpu.memory_space<vmem>>, vector<8x8xf32>
    tpu.vector_store %arg22[%c0_83, %c24], %133 {strides = array<i32>} : memref<16x32xf32, #tpu.memory_space<vmem>>, vector<8x8xf32>,
    %c1_84 = arith.constant 1 : index
    %c0_85 = arith.constant 0 : index
    %c0_86 = arith.constant 0 : index
    %135 = vector.load %arg20[%c1_84, %c0_85, %c0_86] : memref<2x16x16xf32, #tpu.memory_space<vmem>>, vector<1x8x16xf32>
    %136 = vector.shape_cast %135 : vector<1x8x16xf32> to vector<8x16xf32>
    %c1_87 = arith.constant 1 : index
    %c0_88 = arith.constant 0 : index
    %c0_89 = arith.constant 0 : index
    %137 = vector.load %arg21[%c1_87, %c0_88, %c0_89] : memref<2x16x16xf32, #tpu.memory_space<vmem>>, vector<1x8x16xf32>
    %138 = vector.shape_cast %137 : vector<1x8x16xf32> to vector<8x16xf32>
    %139 = vector.extract_strided_slice %26 {offsets = [8, 0], sizes = [8, 8], strides = [1, 1]} : vector<16x32xf32> to vector<8x8xf32>
    %140 = vector.extract_strided_slice %136 {offsets = [0, 0], sizes = [8, 8], strides = [1, 1]} : vector<8x16xf32> to vector<8x8xf32>
    %141 = vector.extract_strided_slice %138 {offsets = [0, 0], sizes = [8, 8], strides = [1, 1]} : vector<8x16xf32> to vector<8x8xf32>
    %cst_90 = arith.constant dense<0.000000e+00> : vector<8x8xf32>
    %142 = tpu.matmul %139, %140, %cst_90 {dimension_numbers = #tpu.dot_dimension_numbers<[1], [1], [0], [0], [0, 0, 1, 0], [], []>} : vector<8x8xf32>, vector<8x8xf32>, vector<8x8xf32> -> vector<8x8xf32>
    %cst_91 = arith.constant 0.353553385 : f32
    %143 = vector.broadcast %cst_91 : f32 to vector<8x8xf32>
    %144 = arith.mulf %142, %143 : vector<8x8xf32>
    %145 = arith.addf %144, %54 : vector<8x8xf32>
    %cst_92 = arith.constant dense<0xFF800000> : vector<8xf32>
    %146 = vector.multi_reduction <maximumf>, %145, %cst_92 [1] : vector<8x8xf32> to vector<8xf32>
    %147 = vector.shape_cast %146 : vector<8xf32> to vector<8x1xf32>
    %148 = vector.broadcast %147 : vector<8x1xf32> to vector<8x8xf32>
    %149 = arith.subf %145, %148 : vector<8x8xf32>
    %150 = math.exp %149 : vector<8x8xf32>
    %cst_93 = arith.constant dense<0.000000e+00> : vector<8xf32>
    %151 = vector.multi_reduction <add>, %150, %cst_93 [1] : vector<8x8xf32> to vector<8xf32>
    %152 = vector.shape_cast %151 : vector<8xf32> to vector<8x1xf32>
    %153 = tpu.reciprocal %152 : vector<8x1xf32> -> vector<8x1xf32>
    %154 = vector.broadcast %153 : vector<8x1xf32> to vector<8x8xf32>
    %155 = arith.mulf %150, %154 : vector<8x8xf32>
    %cst_94 = arith.constant dense<0.000000e+00> : vector<8x8xf32>
    %156 = tpu.matmul %155, %141, %cst_94 {dimension_numbers = #tpu.dot_dimension_numbers<[1], [0], [0], [1], [0, 0, 1, 1], [], []>} : vector<8x8xf32>, vector<8x8xf32>, vector<8x8xf32> -> vector<8x8xf32>
    %c8_95 = arith.constant 8 : index
    %c0_96 = arith.constant 0 : index
    %157 = vector.load %arg22[%c8_95, %c0_96] : memref<16x32xf32, #tpu.memory_space<vmem>>, vector<8x8xf32>
    tpu.vector_store %arg22[%c8_95, %c0_96], %156 {strides = array<i32>} : memref<16x32xf32, #tpu.memory_space<vmem>>, vector<8x8xf32>,
    %158 = vector.extract_strided_slice %26 {offsets = [8, 8], sizes = [8, 8], strides = [1, 1]} : vector<16x32xf32> to vector<8x8xf32>
    %159 = vector.extract_strided_slice %136 {offsets = [0, 0], sizes = [8, 8], strides = [1, 1]} : vector<8x16xf32> to vector<8x8xf32>
    %160 = vector.extract_strided_slice %138 {offsets = [0, 0], sizes = [8, 8], strides = [1, 1]} : vector<8x16xf32> to vector<8x8xf32>
    %cst_97 = arith.constant dense<0.000000e+00> : vector<8x8xf32>
    %161 = tpu.matmul %158, %159, %cst_97 {dimension_numbers = #tpu.dot_dimension_numbers<[1], [1], [0], [0], [0, 0, 1, 0], [], []>} : vector<8x8xf32>, vector<8x8xf32>, vector<8x8xf32> -> vector<8x8xf32>
    %cst_98 = arith.constant 0.353553385 : f32
    %162 = vector.broadcast %cst_98 : f32 to vector<8x8xf32>
    %163 = arith.mulf %161, %162 : vector<8x8xf32>
    %164 = arith.addf %163, %54 : vector<8x8xf32>
    %cst_99 = arith.constant dense<0xFF800000> : vector<8xf32>
    %165 = vector.multi_reduction <maximumf>, %164, %cst_99 [1] : vector<8x8xf32> to vector<8xf32>
    %166 = vector.shape_cast %165 : vector<8xf32> to vector<8x1xf32>
    %167 = vector.broadcast %166 : vector<8x1xf32> to vector<8x8xf32>
    %168 = arith.subf %164, %167 : vector<8x8xf32>
    %169 = math.exp %168 : vector<8x8xf32>
    %cst_100 = arith.constant dense<0.000000e+00> : vector<8xf32>
    %170 = vector.multi_reduction <add>, %169, %cst_100 [1] : vector<8x8xf32> to vector<8xf32>
    %171 = vector.shape_cast %170 : vector<8xf32> to vector<8x1xf32>
    %172 = tpu.reciprocal %171 : vector<8x1xf32> -> vector<8x1xf32>
    %173 = vector.broadcast %172 : vector<8x1xf32> to vector<8x8xf32>
    %174 = arith.mulf %169, %173 : vector<8x8xf32>
    %cst_101 = arith.constant dense<0.000000e+00> : vector<8x8xf32>
    %175 = tpu.matmul %174, %160, %cst_101 {dimension_numbers = #tpu.dot_dimension_numbers<[1], [0], [0], [1], [0, 0, 1, 1], [], []>} : vector<8x8xf32>, vector<8x8xf32>, vector<8x8xf32> -> vector<8x8xf32>
    %c8_102 = arith.constant 8 : index
    %c8_103 = arith.constant 8 : index
    %176 = vector.load %arg22[%c8_102, %c8_103] : memref<16x32xf32, #tpu.memory_space<vmem>>, vector<8x8xf32>
    tpu.vector_store %arg22[%c8_102, %c8_103], %175 {strides = array<i32>} : memref<16x32xf32, #tpu.memory_space<vmem>>, vector<8x8xf32>,
    %177 = vector.extract_strided_slice %26 {offsets = [8, 16], sizes = [8, 8], strides = [1, 1]} : vector<16x32xf32> to vector<8x8xf32>
    %178 = vector.extract_strided_slice %136 {offsets = [0, 8], sizes = [8, 8], strides = [1, 1]} : vector<8x16xf32> to vector<8x8xf32>
    %179 = vector.extract_strided_slice %138 {offsets = [0, 8], sizes = [8, 8], strides = [1, 1]} : vector<8x16xf32> to vector<8x8xf32>
    %cst_104 = arith.constant dense<0.000000e+00> : vector<8x8xf32>
    %180 = tpu.matmul %177, %178, %cst_104 {dimension_numbers = #tpu.dot_dimension_numbers<[1], [1], [0], [0], [0, 0, 1, 0], [], []>} : vector<8x8xf32>, vector<8x8xf32>, vector<8x8xf32> -> vector<8x8xf32>
    %cst_105 = arith.constant 0.353553385 : f32
    %181 = vector.broadcast %cst_105 : f32 to vector<8x8xf32>
    %182 = arith.mulf %180, %181 : vector<8x8xf32>
    %183 = arith.addf %182, %54 : vector<8x8xf32>
    %cst_106 = arith.constant dense<0xFF800000> : vector<8xf32>
    %184 = vector.multi_reduction <maximumf>, %183, %cst_106 [1] : vector<8x8xf32> to vector<8xf32>
    %185 = vector.shape_cast %184 : vector<8xf32> to vector<8x1xf32>
    %186 = vector.broadcast %185 : vector<8x1xf32> to vector<8x8xf32>
    %187 = arith.subf %183, %186 : vector<8x8xf32>
    %188 = math.exp %187 : vector<8x8xf32>
    %cst_107 = arith.constant dense<0.000000e+00> : vector<8xf32>
    %189 = vector.multi_reduction <add>, %188, %cst_107 [1] : vector<8x8xf32> to vector<8xf32>
    %190 = vector.shape_cast %189 : vector<8xf32> to vector<8x1xf32>
    %191 = tpu.reciprocal %190 : vector<8x1xf32> -> vector<8x1xf32>
    %192 = vector.broadcast %191 : vector<8x1xf32> to vector<8x8xf32>
    %193 = arith.mulf %188, %192 : vector<8x8xf32>
    %cst_108 = arith.constant dense<0.000000e+00> : vector<8x8xf32>
    %194 = tpu.matmul %193, %179, %cst_108 {dimension_numbers = #tpu.dot_dimension_numbers<[1], [0], [0], [1], [0, 0, 1, 1], [], []>} : vector<8x8xf32>, vector<8x8xf32>, vector<8x8xf32> -> vector<8x8xf32>
    %c8_109 = arith.constant 8 : index
    %c16_110 = arith.constant 16 : index
    %195 = vector.load %arg22[%c8_109, %c16_110] : memref<16x32xf32, #tpu.memory_space<vmem>>, vector<8x8xf32>
    tpu.vector_store %arg22[%c8_109, %c16_110], %194 {strides = array<i32>} : memref<16x32xf32, #tpu.memory_space<vmem>>, vector<8x8xf32>,
    %196 = vector.extract_strided_slice %26 {offsets = [8, 24], sizes = [8, 8], strides = [1, 1]} : vector<16x32xf32> to vector<8x8xf32>
    %197 = vector.extract_strided_slice %136 {offsets = [0, 8], sizes = [8, 8], strides = [1, 1]} : vector<8x16xf32> to vector<8x8xf32>
    %198 = vector.extract_strided_slice %138 {offsets = [0, 8], sizes = [8, 8], strides = [1, 1]} : vector<8x16xf32> to vector<8x8xf32>
    %cst_111 = arith.constant dense<0.000000e+00> : vector<8x8xf32>
    %199 = tpu.matmul %196, %197, %cst_111 {dimension_numbers = #tpu.dot_dimension_numbers<[1], [1], [0], [0], [0, 0, 1, 0], [], []>} : vector<8x8xf32>, vector<8x8xf32>, vector<8x8xf32> -> vector<8x8xf32>
    %cst_112 = arith.constant 0.353553385 : f32
    %200 = vector.broadcast %cst_112 : f32 to vector<8x8xf32>
    %201 = arith.mulf %199, %200 : vector<8x8xf32>
    %202 = arith.addf %201, %54 : vector<8x8xf32>
    %cst_113 = arith.constant dense<0xFF800000> : vector<8xf32>
    %203 = vector.multi_reduction <maximumf>, %202, %cst_113 [1] : vector<8x8xf32> to vector<8xf32>
    %204 = vector.shape_cast %203 : vector<8xf32> to vector<8x1xf32>
    %205 = vector.broadcast %204 : vector<8x1xf32> to vector<8x8xf32>
    %206 = arith.subf %202, %205 : vector<8x8xf32>
    %207 = math.exp %206 : vector<8x8xf32>
    %cst_114 = arith.constant dense<0.000000e+00> : vector<8xf32>
    %208 = vector.multi_reduction <add>, %207, %cst_114 [1] : vector<8x8xf32> to vector<8xf32>
    %209 = vector.shape_cast %208 : vector<8xf32> to vector<8x1xf32>
    %210 = tpu.reciprocal %209 : vector<8x1xf32> -> vector<8x1xf32>
    %211 = vector.broadcast %210 : vector<8x1xf32> to vector<8x8xf32>
    %212 = arith.mulf %207, %211 : vector<8x8xf32>
    %cst_115 = arith.constant dense<0.000000e+00> : vector<8x8xf32>
    %213 = tpu.matmul %212, %198, %cst_115 {dimension_numbers = #tpu.dot_dimension_numbers<[1], [0], [0], [1], [0, 0, 1, 1], [], []>} : vector<8x8xf32>, vector<8x8xf32>, vector<8x8xf32> -> vector<8x8xf32>
    %c8_116 = arith.constant 8 : index
    %c24_117 = arith.constant 24 : index
    %214 = vector.load %arg22[%c8_116, %c24_117] : memref<16x32xf32, #tpu.memory_space<vmem>>, vector<8x8xf32>
    tpu.vector_store %arg22[%c8_116, %c24_117], %213 {strides = array<i32>} : memref<16x32xf32, #tpu.memory_space<vmem>>, vector<8x8xf32>,
    %c0_118 = arith.constant 0 : index
    %c0_119 = arith.constant 0 : index
    %215 = vector.load %arg22[%c0_118, %c0_119] : memref<16x32xf32, #tpu.memory_space<vmem>>, vector<16x32xf32>
    %c0_120 = arith.constant 0 : index
    %c0_121 = arith.constant 0 : index
    %216 = vector.load %arg6[%c0_120, %c0_121] : memref<32x32xf32, #tpu.memory_space<vmem>>, vector<32x32xf32>
    %cst_122 = arith.constant dense<0.000000e+00> : vector<16x32xf32>
    %217 = tpu.matmul %215, %216, %cst_122 {dimension_numbers = #tpu.dot_dimension_numbers<[1], [0], [0], [1], [0, 0, 1, 1], [], []>} : vector<16x32xf32>, vector<32x32xf32>, vector<16x32xf32> -> vector<16x32xf32>
    %218 = arith.addf %0, %217 : vector<16x32xf32>
    %c0_123 = arith.constant 0 : index
    %c0_124 = arith.constant 0 : index
    %219 = vector.load %arg2[%c0_123, %c0_124] : memref<1x32xf32, #tpu.memory_space<vmem>>, vector<1x32xf32>
    %220 = arith.mulf %218, %218 : vector<16x32xf32>
    %cst_125 = arith.constant dense<0.000000e+00> : vector<16xf32>
    %221 = vector.multi_reduction <add>, %220, %cst_125 [1] : vector<16x32xf32> to vector<16xf32>
    %222 = vector.shape_cast %221 : vector<16xf32> to vector<16x1xf32>
    %cst_126 = arith.constant 3.200000e+01 : f32
    %223 = vector.broadcast %cst_126 : f32 to vector<16x1xf32>
    %224 = arith.divf %222, %223 : vector<16x1xf32>
    %cst_127 = arith.constant 9.99999974E-6 : f32
    %225 = vector.broadcast %cst_127 : f32 to vector<16x1xf32>
    %226 = arith.addf %224, %225 : vector<16x1xf32>
    %227 = math.rsqrt %226 : vector<16x1xf32>
    %228 = vector.broadcast %227 : vector<16x1xf32> to vector<16x32xf32>
    %229 = arith.mulf %218, %228 : vector<16x32xf32>
    %230 = vector.broadcast %219 : vector<1x32xf32> to vector<16x32xf32>
    %231 = arith.mulf %229, %230 : vector<16x32xf32>
    %c0_128 = arith.constant 0 : index
    %c0_129 = arith.constant 0 : index
    %232 = vector.load %arg7[%c0_128, %c0_129] : memref<32x96xf32, #tpu.memory_space<vmem>>, vector<32x96xf32>
    %cst_130 = arith.constant dense<0.000000e+00> : vector<16x96xf32>
    %233 = tpu.matmul %231, %232, %cst_130 {dimension_numbers = #tpu.dot_dimension_numbers<[1], [0], [0], [1], [0, 0, 1, 1], [], []>} : vector<16x32xf32>, vector<32x96xf32>, vector<16x96xf32> -> vector<16x96xf32>
    %cst_131 = arith.constant 0.000000e+00 : f32
    %234 = vector.broadcast %cst_131 : f32 to vector<16x96xf32>
    %235 = arith.subf %234, %233 : vector<16x96xf32>
    %236 = math.exp %235 : vector<16x96xf32>
    %cst_132 = arith.constant 1.000000e+00 : f32
    %237 = vector.broadcast %cst_132 : f32 to vector<16x96xf32>
    %238 = arith.addf %237, %236 : vector<16x96xf32>
    %cst_133 = arith.constant 1.000000e+00 : f32
    %239 = vector.broadcast %cst_133 : f32 to vector<16x96xf32>
    %240 = arith.divf %239, %238 : vector<16x96xf32>
    %241 = arith.mulf %233, %240 : vector<16x96xf32>
    %c0_134 = arith.constant 0 : index
    %c0_135 = arith.constant 0 : index
    %242 = vector.load %arg9[%c0_134, %c0_135] : memref<32x96xf32, #tpu.memory_space<vmem>>, vector<32x96xf32>
    %cst_136 = arith.constant dense<0.000000e+00> : vector<16x96xf32>
    %243 = tpu.matmul %231, %242, %cst_136 {dimension_numbers = #tpu.dot_dimension_numbers<[1], [0], [0], [1], [0, 0, 1, 1], [], []>} : vector<16x32xf32>, vector<32x96xf32>, vector<16x96xf32> -> vector<16x96xf32>
    %244 = arith.mulf %241, %243 : vector<16x96xf32>
    %c0_137 = arith.constant 0 : index
    %c0_138 = arith.constant 0 : index
    %245 = vector.load %arg8[%c0_137, %c0_138] : memref<96x32xf32, #tpu.memory_space<vmem>>, vector<96x32xf32>
    %cst_139 = arith.constant dense<0.000000e+00> : vector<16x32xf32>
    %246 = tpu.matmul %244, %245, %cst_139 {dimension_numbers = #tpu.dot_dimension_numbers<[1], [0], [0], [1], [0, 0, 1, 1], [], []>} : vector<16x96xf32>, vector<96x32xf32>, vector<16x32xf32> -> vector<16x32xf32>
    %247 = arith.addf %218, %246 : vector<16x32xf32>
    %c0_140 = arith.constant 0 : index
    %c0_141 = arith.constant 0 : index
    %248 = vector.load %arg19[%c0_140, %c0_141] : memref<16x32xf32, #tpu.memory_space<vmem>>, vector<16x32xf32>
    tpu.vector_store %arg19[%c0_140, %c0_141], %247 {strides = array<i32>} : memref<16x32xf32, #tpu.memory_space<vmem>>, vector<16x32xf32>,
    return
  }
}

</mosaic_0001>

<bundles_post_ra>
// kernel: tpu_custom_call.1
= control target key start
LH: loop header
LB: loop body
LE: loop exit
PB: predicated region body
PF: predicated region fallthrough
CT: control target
= control target key end

     0   :  { %s2370_s0 = inlined_call_operand.hbm [shape: f32[16,32], index: 0, kind: input, shape index: {}]   ;;  %s2371_s1 = inlined_call_operand.vmem [shape: f32[1,32], index: 1, kind: input, shape index: {}]   ;;  %s2372_s2 = inlined_call_operand.hbm [shape: f32[1,32], index: 2, kind: input, shape index: {}]   ;;  %s2373_s3 = inlined_call_operand.vmem [shape: f32[32,32], index: 3, kind: input, shape index: {}]   ;;  %s2374_s4 = inlined_call_operand.vmem [shape: f32[32,16], index: 4, kind: input, shape index: {}]   ;;  %s2375_s5 = inlined_call_operand.vmem [shape: f32[32,16], index: 5, kind: input, shape index: {}]   ;;  %s2376_s6 = inlined_call_operand.vmem [shape: f32[32,32], index: 6, kind: input, shape index: {}]   ;;  %s2377_s7 = inlined_call_operand.vmem [shape: f32[32,96], index: 7, kind: input, shape index: {}]   ;;  %s2378_s8 = inlined_call_operand.vmem [shape: f32[96,32], index: 8, kind: input, shape index: {}]   ;;  %s2379_s9 = inlined_call_operand.vmem [shape: f32[32,96], index: 9, kind: input, shape index: {}]   ;;  %s2380_s10 = inlined_call_operand.vmem [shape: f32[32,32], index: 10, kind: input, shape index: {}]   ;;  %s2381_s11 = inlined_call_operand.hbm [shape: f32[16,16], index: 11, kind: input, shape index: {}]   ;;  %s2382_s12 = inlined_call_operand.hbm [shape: f32[16,32], index: 12, kind: input, shape index: {}]   ;;  %s2383_s13 = inlined_call_operand.hbm [shape: f32[16,32], index: 13, kind: input, shape index: {}]   ;;  %s2384_s14 = inlined_call_operand.hbm [shape: f32[16,16], index: 14, kind: input, shape index: {}]   ;;  %s2385_s15 = inlined_call_operand.hbm [shape: f32[16,16], index: 15, kind: input, shape index: {}]   ;;  %s2386_s16 = inlined_call_operand.hbm [shape: f32[8,8], index: 16, kind: input, shape index: {}]   ;;  %s2387_s17 = inlined_call_operand.hbm [shape: f32[2,16,16], index: 17, kind: input, shape index: {}]   ;;  %s2388_s18 = inlined_call_operand.vmem [shape: f32[2,16,16], index: 18, kind: input, shape index: {}]   ;;  %s2389_s19 = inlined_call_operand.hbm [shape: f32[16,32], index: 19, kind: output, shape index: {0}]   ;;  %s2390_s20 = inlined_call_operand.hbm [shape: f32[2,16,16], index: 20, kind: output, shape index: {1}]   ;;  %s2391_s21 = inlined_call_operand.hbm [shape: f32[2,16,16], index: 21, kind: output, shape index: {2}]  }
   0x1   :  { %2395 = sst [smem:[#allocation29_spill]] %s2370_s0 }
   0x2   :  { %2396 = sst [smem:[#allocation30_spill]] %s2371_s1 }
   0x3   :  { %2397 = sst [smem:[#allocation31_spill]] %s2372_s2 }
   0x4   :  { %2398 = sst [smem:[#allocation32_spill]] %s2373_s3 }
   0x5   :  { %2399 = sst [smem:[#allocation33_spill]] %s2374_s4 }
   0x6   :  { %2400 = sst [smem:[#allocation34_spill]] %s2375_s5 }
   0x7   :  { %27 = vsyncpa [#allocation4], 0 }
   0x8   :  { %28 = vsyncpa [#allocation7], 0 }
   0x9   :  { %29 = vsyncpa [#allocation10], 0 }
   0xa   :  { %30 = vsyncpa [#allocation13], 0 }
   0xb   :  { %31 = vsyncpa [#allocation16], 0 }
   0xc   :  { %32 = vsyncpa [#allocation5], 0  ;;  %s2401_s26 = sld [smem:[#allocation31_spill]] }
  0x12   :  { %s54_s27 = sshll.u32 %s2401_s26, 4  ;;  %s55_s27 = int_to_ptr.hbm [resolvable:$true] %s54_s27 }
  0x13   :  { %33 = vsyncpa [#allocation20], 0  ;;  %s1795_s3 = smov [#allocation6]   ;;  %s93_s4 = sshll.u32 %s2382_s12, 4  ;;  %s94_s4 = int_to_ptr.hbm [resolvable:$true] %s93_s4 }
  0x14   :  { %s56_s28 = sshll.u32 %s1795_s3, 4  ;;  %s1796_s30 = smov [#allocation9]   ;;  %s57_s28 = int_to_ptr.vmem [resolvable:$true] %s56_s28 }
  0x15   :  { %59 = dma.hbm_to_vmem [thread:$0]  %s55_s27, 16, %s57_s28, [#allocation7]  }
  0x16   :  { %s95_s5 = sshll.u32 %s1796_s30, 4  ;;  %s119_s1 = sshll.u32 %s2384_s14, 4  ;;  %s96_s5 = int_to_ptr.vmem [resolvable:$true] %s95_s5  ;;  %s120_s1 = int_to_ptr.hbm [resolvable:$true] %s119_s1 }
  0x17   :  { %s1797_s24 = smov 128   ;;  %s1798_s2 = smov 8  }
  0x18   :  { %101 = dma.hbm_to_vmem [thread:$0]  %s94_s4, 256, %s96_s5, [#allocation10], %s1797_s24, %s1797_s24, %s1798_s2  }
  0x19   :  { %s146_s27 = sshll.u32 %s2386_s16, 4  ;;  %s1799_s12 = smov [#allocation12]   ;;  %s147_s27 = int_to_ptr.hbm [resolvable:$true] %s146_s27 }
  0x1a   :  { %s121_s3 = sshll.u32 %s1799_s12, 4  ;;  %s1800_s14 = smov [#allocation15]   ;;  %s122_s3 = int_to_ptr.vmem [resolvable:$true] %s121_s3 }
  0x1b   :  { %127 = dma.hbm_to_vmem [thread:$0]  %s120_s1, 256, %s122_s3, [#allocation13], %s1797_s24, %s1797_s24, %s1798_s2  }
  0x1c   :  { %s148_s28 = sshll.u32 %s1800_s14, 4  ;;  %s2402_s30 = sld [smem:[#allocation29_spill]]  ;;  %s149_s28 = int_to_ptr.vmem [resolvable:$true] %s148_s28 }
  0x1d   :  { %151 = dma.hbm_to_vmem [thread:$0]  %s147_s27, 128, %s149_s28, [#allocation16]  }
  0x1e   :  { %s80_s16 = sshll.u32 %s2381_s11, 4  ;;  %s1801_s23 = smov [#allocation3]   ;;  %s81_s16 = int_to_ptr.hbm [resolvable:$true] %s80_s16 }
  0x1f   :  { %s40_s25 = sshll.u32 %s1801_s23, 4  ;;  %s1802_s1 = smov [#allocation8]   ;;  %s41_s25 = int_to_ptr.vmem [resolvable:$true] %s40_s25 }
  0x20   :  { %s82_s26 = sshll.u32 %s1802_s1, 4  ;;  %s106_s14 = sshll.u32 %s2383_s13, 4  ;;  %s83_s26 = int_to_ptr.vmem [resolvable:$true] %s82_s26  ;;  %s107_s14 = int_to_ptr.hbm [resolvable:$true] %s106_s14 }
  0x21   :  { %88 = dma.hbm_to_vmem [thread:$0]  %s81_s16, 256, %s83_s26, [#allocation7], %s1797_s24, %s1797_s24, %s1798_s2  }
  0x22   :  { %s38_s22 = sshll.u32 %s2402_s30, 4  ;;  %s132_s28 = sshll.u32 %s2385_s15, 4  ;;  %s39_s22 = int_to_ptr.hbm [resolvable:$true] %s38_s22  ;;  %s133_s28 = int_to_ptr.hbm [resolvable:$true] %s132_s28 }
  0x23   :  { %46 = dma.hbm_to_vmem [thread:$0]  %s39_s22, 256, %s41_s25, [#allocation4], %s1797_s24, %s1797_s24, %s1798_s2  }
  0x24   :  { %s1803_s29 = smov [#allocation11]   ;;  %s1804_s30 = smov [#allocation14]  }
  0x25   :  { %s108_s0 = sshll.u32 %s1803_s29, 4  ;;  %s134_s13 = sshll.u32 %s1804_s30, 4  ;;  %s109_s0 = int_to_ptr.vmem [resolvable:$true] %s108_s0  ;;  %s135_s13 = int_to_ptr.vmem [resolvable:$true] %s134_s13 }
  0x26   :  { %114 = dma.hbm_to_vmem [thread:$0]  %s107_s14, 256, %s109_s0, [#allocation10], %s1797_s24, %s1797_s24, %s1798_s2  }
  0x27   :  { %s156_s5 = sshll.u32 %s2387_s17, 4  ;;  %s1805_s15 = smov [#allocation17]   ;;  %s157_s5 = int_to_ptr.hbm [resolvable:$true] %s156_s5 }
  0x28   :  { %140 = dma.hbm_to_vmem [thread:$0]  %s133_s28, 256, %s135_s13, [#allocation13], %s1797_s24, %s1797_s24, %s1798_s2  }
  0x29   :  { %s158_s16 = sshll.u32 %s1805_s15, 4  ;;  %s159_s16 = int_to_ptr.vmem [resolvable:$true] %s158_s16 }
  0x2a   :  { %164 = dma.hbm_to_vmem [thread:$0]  %s157_s5, 512, %s159_s16, [#allocation16], %s1797_s24, %s1797_s24, %s1798_s2  }
  0x2b   :  { %1781 = dma.done.wait [#allocation4], 256  }
  0x2c   :  { %1782 = vsyncadd [#allocation4], 4294967040 }
  0x2d   :  { %1783 = dma.done.wait [#allocation7], 272  }
  0x2e   :  { %1784 = vsyncadd [#allocation7], 4294967024 }
  0x2f   :  { %1785 = dma.done.wait [#allocation10], 512  }
  0x30   :  { %1786 = vsyncadd [#allocation10], 4294966784 }
  0x31   :  { %1787 = dma.done.wait [#allocation13], 512  }
  0x32   :  { %1788 = vsyncadd [#allocation13], 4294966784 }
  0x33   :  { %1789 = dma.done.wait [#allocation16], 640  }
  0x34   :  { %1790 = vsyncadd [#allocation16], 4294966656  ;;  %v1973_v0 = vld [vmem:[#allocation3] sm:$0xff]  ;;  %vm208_vm0 = vcmask 261120   ;;  %v1977_v2 = vld [vmem:[#allocation3 + $0x8] sm:$0xff]  ;;  %v1806_v6 = vmov 32.0  }
  0x35   :  { %v206_v1 = vmul.f32 %v1973_v0, %v1973_v0  ;;  %v207_v4 = vmul.f32 %v1977_v2, %v1977_v2  ;;  %1443 = vrcp.f32 %v1806_v6  ;;  %s2403_s25 = sld [smem:[#allocation32_spill]]  ;;  %v347_v33 = vld [vmem:[%s2380_s10 + $0x18] sm:$0xff]  ;;  %v346_v34 = vld [vmem:[%s2380_s10 + $0x10] sm:$0xff]  ;;  %v345_v37 = vld [vmem:[%s2380_s10 + $0x8] sm:$0xff]  ;;  %vm389_vm8 = vcmask 130048   ;;  %s1808_s1 = smov 120  }
  0x36   :  { %s2404_s12 = sld [smem:[#allocation33_spill]]  ;;  %v388_v35 = vld [vmem:[#allocation8 + $0x8] sm:$0xff]  ;;  %v344_v54 = vld [vmem:[%s2380_s10] sm:$0xff]  ;;  %v383_v6 = vld [vmem:[#allocation12] sm:$0xff]  ;;  %s1807_s10 = smov 112   ;;  %vm450_vm9 = vcmask 64512  }
  0x37   :  { %v209_v3 = vsel %vm208_vm0, %v206_v1, 0.0  ;;  %v212_v5 = vsel %vm208_vm0, %v207_v4, 0.0  ;;  %s2405_s17 = sld [smem:[#allocation34_spill]]  ;;  %v387_v55 = vld [vmem:[#allocation8] sm:$0xff]  ;;  %v435_v57 = vld [vmem:[%s2388_s18 + $0x10] sm:$0xff]  ;;  %s1810_s26 = smov 24  }
  0x38   :  { %210 = vadd.xlane.f32.xlu0 %v209_v3  ;;  %s2406_s22 = sld [smem:[#allocation30_spill]]  ;;  %v433_v56 = vld [vmem:[%s2388_s18] sm:$0xff]  ;;  %439 = vst.msk [vmem:[#allocation21 + $0x10] sm:$0xff] %vm389_vm8, %v435_v57  ;;  %v427_v4 = vld [vmem:[#allocation17 + $0x10] sm:$0xff]  ;;  %s1336_s27 = sshll.u32 %s2390_s20, 4  ;;  %s1337_s27 = int_to_ptr.hbm [resolvable:$true] %s1336_s27 }
  0x39   :  { %437 = vst.msk [vmem:[#allocation21] sm:$0xff] %vm389_vm8, %v433_v56  ;;  %v425_v3 = vld [vmem:[#allocation17] sm:$0xff]  ;;  %s1813_s28 = smov [#allocation21]   ;;  %s1323_s16 = sshll.u32 %s2389_s19, 4  ;;  %s1324_s16 = int_to_ptr.hbm [resolvable:$true] %s1323_s16 }
  0x3a   :  { %429 = vst.msk [vmem:[#allocation19] sm:$0xff] %vm389_vm8, %v425_v3  ;;  %s1347_s29 = sshll.u32 %s1813_s28, 4  ;;  %s1348_s29 = int_to_ptr.vmem [resolvable:$true] %s1347_s29 }
  0x3b   :  { %v1444_v7 = vpop.eup %1443  ;;  %v256_v10 = vld [vmem:[%s2403_s25 + $0x18] sm:$0xff]  ;;  %v255_v12 = vld [vmem:[%s2403_s25 + $0x10] sm:$0xff]  ;;  %v254_v15 = vld [vmem:[%s2403_s25 + $0x8] sm:$0xff]  ;;  %431 = vst.msk [vmem:[#allocation19 + $0x10] sm:$0xff] %vm389_vm8, %v427_v4 }
  0x3c   :  { %v216_v8 = vmul.f32 32.0, %v1444_v7  ;;  %v289_v11 = vld [vmem:[%s2404_s12 + $0x18] sm:$0xff]  ;;  %275 = vmatpush.msra.mxu0 %v256_v10  ;;  %v288_v13 = vld [vmem:[%s2404_s12 + $0x10] sm:$0xff]  ;;  %v287_v16 = vld [vmem:[%s2404_s12 + $0x8] sm:$0xff]  ;;  %vm220_vm1 = vweird.f32 %v1444_v7 }
  0x3d   :  { %302 = vmatpush.msra.mxu2 %v289_v11  ;;  %1417 = vmatpush.msra.mxu3 %v289_v11  ;;  %v253_v17 = vld [vmem:[%s2403_s25] sm:$0xff]  ;;  %v316_v20 = vld [vmem:[%s2405_s17 + $0x18] sm:$0xff]  ;;  %v315_v21 = vld [vmem:[%s2405_s17 + $0x10] sm:$0xff]  ;;  %s1809_s25 = smov 104  }
  0x3e   :  { %v217_v9 = vsub.f32 1.0, %v216_v8  ;;  %276 = vmatpush.msra.mxu0 %v255_v12  ;;  %v286_v18 = vld [vmem:[%s2404_s12] sm:$0xff]  ;;  %v314_v22 = vld [vmem:[%s2405_s17 + $0x8] sm:$0xff]  ;;  %s1811_s12 = smov 16  }
  0x3f   :  { %303 = vmatpush.msra.mxu2 %v288_v13  ;;  %1418 = vmatpush.msra.mxu3 %v288_v13  ;;  %v313_v24 = vld [vmem:[%s2405_s17] sm:$0xff] }
  0x40   :  { %213 = vadd.xlane.f32.xlu0 %v212_v5  ;;  %v218_v14 = vmul.f32 %v1444_v7, %v217_v9  ;;  %277 = vmatpush.msra.mxu0 %v254_v15  ;;  %v1441_v43 = vld [vmem:[%s2406_s22] ss:$0 sm:$0xff]  ;;  %v340_v5 = vld [vmem:[#allocation9] sm:$0xff]  ;;  %v419_v8 = vld [vmem:[#allocation14] sm:$0xff] }
  0x41   :  { %304 = vmatpush.msra.mxu2 %v287_v16  ;;  %1419 = vmatpush.msra.mxu3 %v287_v16 }
  0x42   :  { %v219_v19 = vadd.f32 %v1444_v7, %v218_v14  ;;  %278 = vmatpush.msra.mxu0 %v253_v17  ;;  %v341_v17 = vld [vmem:[#allocation9 + $0x8] sm:$0xff] }
  0x43   :  { %305 = vmatpush.msra.mxu2 %v286_v18  ;;  %1420 = vmatpush.msra.mxu3 %v286_v18  ;;  %v384_v18 = vld [vmem:[#allocation12 + $0x8] sm:$0xff] }
  0x44   :  { %v2016_v23 = vsel %vm220_vm1, %v1444_v7, %v219_v19  ;;  %410 = vmatpush.msrb.mxu0 %v388_v35  ;;  %v377_v7 = vld [vmem:[#allocation11] sm:$0xff]  ;;  %v378_v19 = vld [vmem:[#allocation11 + $0x8] sm:$0xff]  ;;  %v2085_v35 = vld [vmem:[#allocation15] sm:$0xff] }
  0x45   :  { %329 = vmatpush.msrb.mxu2 %v316_v20  ;;  %366 = vmatpush.msrb.mxu3 %v347_v33  ;;  %v420_v20 = vld [vmem:[#allocation14 + $0x8] sm:$0xff] }
  0x46   :  { %411 = vmatpush.msrb.mxu0 %v387_v55 }
  0x47   :  { %330 = vmatpush.msrb.mxu2 %v315_v21  ;;  %367 = vmatpush.msrb.mxu3 %v346_v34 }
  0x49   :  { %331 = vmatpush.msrb.mxu2 %v314_v22  ;;  %368 = vmatpush.msrb.mxu3 %v345_v37 }
  0x4b   :  { %332 = vmatpush.msrb.mxu2 %v313_v24  ;;  %369 = vmatpush.msrb.mxu3 %v344_v54 }
  0xab   :  { %v211_v25 = vpop.xlane.xlu0 %210 }
  0xac   :  { %v222_v26 = vmul.f32 %v2016_v23, %v211_v25 }
  0xae   :  { %v224_v27 = vadd.f32 1e-05, %v222_v26 }
  0xb0   :  { %1445 = vrsqrt.f32 %v224_v27  ;;  %vm232_vm3 = vweird.f32 %v224_v27 }
  0xb3   :  { %v214_v28 = vpop.xlane.xlu0 %213 }
  0xb4   :  { %v223_v29 = vmul.f32 %v2016_v23, %v214_v28 }
  0xb6   :  { %v1446_v30 = vpop.eup %1445  ;;  %v225_v31 = vadd.f32 1e-05, %v223_v29 }
  0xb7   :  { %v227_v32 = vmul.f32 %v1446_v30, %v224_v27  ;;  %vm233_vm2 = vweird.f32 %v1446_v30 }
  0xb8   :  { %1447 = vrsqrt.f32 %v225_v31  ;;  %vm234_vm4 = vmor %vm232_vm3, %vm233_vm2  ;;  %vm242_vm5 = vweird.f32 %v225_v31 }
  0xb9   :  { %v228_v36 = vmul.f32 %v1446_v30, %v227_v32 }
  0xbb   :  { %v229_v38 = vmul.f32 0.5, %v228_v36 }
  0xbd   :  { %v230_v39 = vsub.f32 1.5, %v229_v38 }
  0xbe   :  { %v1448_v40 = vpop.eup %1447 }
  0xbf   :  { %v231_v41 = vmul.f32 %v1446_v30, %v230_v39  ;;  %v237_v42 = vmul.f32 %v1448_v40, %v225_v31  ;;  %vm243_vm6 = vweird.f32 %v1448_v40 }
  0xc0   :  { %vm244_vm7 = vmor %vm242_vm5, %vm243_vm6 }
  0xc1   :  { %v238_v44 = vmul.f32 %v1448_v40, %v237_v42  ;;  %v235_v45 = vsel %vm234_vm4, %v1446_v30, %v231_v41 }
  0xc2   :  { %v246_v46 = vmul.f32 %v235_v45, %v1973_v0 }
  0xc3   :  { %v239_v47 = vmul.f32 0.5, %v238_v44 }
  0xc4   :  { %v251_v48 = vmul.f32 %v1441_v43, %v246_v46 }
  0xc5   :  { %v240_v49 = vsub.f32 1.5, %v239_v47 }
  0xc6   :  { %1375 = vmatmul.msk.f32.vlgmr.msra.gmra.mxu0 %vm208_vm0, %v251_v48  ;;  %1377 = vmatmul.msk.f32.vlgmr.msra.gmra.mxu2 %vm208_vm0, %v251_v48 }
  0xc7   :  { %v241_v50 = vmul.f32 %v1448_v40, %v240_v49 }
  0xc9   :  { %v245_v51 = vsel %vm244_vm7, %v1448_v40, %v241_v50 }
  0xca   :  { %v247_v52 = vmul.f32 %v245_v51, %v1977_v2 }
  0xcc   :  { %v252_v53 = vmul.f32 %v1441_v43, %v247_v52 }
  0xce   :  { %1376 = vmatmul.msk.f32.gmra.mxu0 %vm208_vm0, %v252_v53  ;;  %1378 = vmatmul.msk.f32.vlgmr.msra.gmra.mxu3 %vm208_vm0, %v252_v53 }
  0xcf   :  { %1379 = vmatmul.msk.f32.vlgmr.msrb.gmra.mxu2 %vm208_vm0, %v251_v48 }
  0xd7   :  { %1380 = vmatmul.msk.f32.gmra.mxu2 %vm208_vm0, %v252_v53 }
 0x143   :  { %v280_v58 = vpop.f32.mrf.mxu0 }
 0x144   :  { %1381 = vmatmul.msk.f32.vlgmr.msrb.gmra.mxu3 %vm208_vm0, %v280_v58  ;;  %v342_v11 = vmul.f32 %v340_v5, %v280_v58 }
 0x149   :  { %v307_v59 = vpop.f32.mrf.mxu2 }
 0x14a   :  { %1383 = vmatmul.msk.f32.vlgmr.msrb.gmra.mxu0 %vm389_vm8, %v307_v59  ;;  %v385_v12 = vmul.f32 %v383_v6, %v307_v59 }
 0x14b   :  { %v283_v60 = vpop.f32.mrf.mxu0 }
 0x14c   :  { %1382 = vmatmul.msk.f32.gmra.mxu3 %vm208_vm0, %v283_v60  ;;  %v343_v24 = vmul.f32 %v341_v17, %v283_v60 }
 0x151   :  { %v310_v61 = vpop.f32.mrf.mxu3 }
 0x152   :  { %v334_v62 = vpop.f32.mrf.mxu2  ;;  %1384 = vmatmul.msk.f32.gmra.mxu0 %vm389_vm8, %v310_v61  ;;  %v386_v25 = vmul.f32 %v384_v18, %v310_v61 }
 0x153   :  { %442 = vst.msk [vmem:[#allocation21] sm:$0xff] %vm389_vm8, %v334_v62 }
 0x15a   :  { %v2059_v63 = vld [vmem:[#allocation21] sm:$0xff]  ;;  %v337_v1 = vpop.f32.mrf.mxu2 }
 0x15b   :  { %521 = vmatpush.msra.mxu2 %v2059_v63  ;;  %446 = vst.msk [vmem:[#allocation21 + $0x10] sm:$0xff] %vm389_vm8, %v337_v1 }
 0x1c7   :  { %v371_v9 = vpop.f32.mrf.mxu3  ;;  %v413_v10 = vpop.f32.mrf.mxu0 }
 0x1c8   :  { %v379_v13 = vmul.f32 %v377_v7, %v371_v9  ;;  %v421_v14 = vmul.f32 %v419_v8, %v413_v10 }
 0x1ca   :  { %v381_v15 = vadd.f32 %v379_v13, %v342_v11  ;;  %v423_v16 = vadd.f32 %v421_v14, %v385_v12 }
 0x1cc   :  { %441 = vst.msk [vmem:[#allocation19] sm:$0xff] %vm389_vm8, %v423_v16  ;;  %606 = vrot.lane.b32.xlu0 %v381_v15, %s1807_s10 }
 0x1cf   :  { %v374_v21 = vpop.f32.mrf.mxu3  ;;  %v416_v22 = vpop.f32.mrf.mxu0 }
 0x1d0   :  { %v380_v26 = vmul.f32 %v378_v19, %v374_v21  ;;  %v422_v27 = vmul.f32 %v420_v20, %v416_v22 }
 0x1d2   :  { %v2066_v28 = vadd.f32 %v380_v26, %v343_v24  ;;  %v424_v29 = vadd.f32 %v422_v27, %v386_v25 }
 0x1d3   :  { %v448_v30 = vld [vmem:[#allocation19] sm:$0xff] }
 0x1d4   :  { %444 = vst.msk [vmem:[#allocation19 + $0x10] sm:$0xff] %vm389_vm8, %v424_v29  ;;  %608 = vrot.lane.b32.xlu2 %v448_v30, %s1808_s1  ;;  %1385 = vmatpush.xpose.msk.msra.mxu1 %vm450_vm9, %v448_v30 }
 0x1d5   :  { %1388 = vmatpush.xpose.msk.msra.mxu3 %vm450_vm9, %v448_v30  ;;  %1014 = vrot.lane.b32.xlu0 %v2066_v28, %s1809_s25 }
 0x1d7   :  { %1386 = vmatmul.msk.f32.vlgmr.msra.gmra.mxu1 %vm450_vm9, %v381_v15 }
 0x1d8   :  { %595 = vmatpush.msrb.mxu1 %v2059_v63 }
 0x1db   :  { %v772_v31 = vld [vmem:[#allocation19 + $0x10] sm:$0xff] }
 0x1dc   :  { %527 = vrot.lane.b32.xlu2 %v381_v15, %s1808_s1 }
 0x1e4   :  { %930 = vrot.lane.b32.xlu2 %v772_v31, %s1808_s1 }
 0x1ec   :  { %928 = vrot.lane.b32.xlu2 %v2066_v28, %s1807_s10 }
 0x1f4   :  { %850 = vrot.lane.b32.xlu2 %v2066_v28, %s1808_s1 }
 0x22e   :  { %v609_v32 = vpop.permute.xlu2 %608 }
 0x22f   :  { %1391 = vmatpush.xpose.msk.msrb.mxu2 %vm450_vm9, %v609_v32  ;;  %1394 = vmatpush.xpose.msk.msra.mxu0 %vm450_vm9, %v609_v32 }
 0x233   :  { %1400 = vmatpush.xpose.msk.msrb.mxu0 %vm450_vm9, %v772_v31 }
 0x236   :  { %v528_v33 = vpop.permute.xlu2 %527 }
 0x237   :  { %1389 = vmatmul.msk.f32.vlgmr.msra.gmra.mxu3 %vm450_vm9, %v528_v33 }
 0x23e   :  { %v931_v53 = vpop.permute.xlu2 %930  ;;  %v607_v1 = vpop.permute.xlu0 %606 }
 0x246   :  { %v929_v61 = vpop.permute.xlu2 %928 }
 0x247   :  { %v1015_v4 = vpop.permute.xlu0 %1014 }
 0x24e   :  { %v851_v3 = vpop.permute.xlu2 %850 }
 0x254   :  { %v474_v34 = vpop.f32.mrf.mxu1 }
 0x255   :  { %v477_v36 = vmul.f32 0.35355338, %v474_v34 }
 0x257   :  { %v478_v37 = vadd.f32 %v477_v36, %v2085_v35 }
 0x259   :  { %v479_v38 = vsel %vm450_vm9, %v478_v37, -inf }
 0x25a   :  { %480 = vmax.xlane.f32.xlu1 %v479_v38 }
 0x2ba   :  { %v548_v39 = vpop.f32.mrf.mxu3 }
 0x2bb   :  { %v551_v40 = vmul.f32 0.35355338, %v548_v39 }
 0x2bd   :  { %v552_v41 = vadd.f32 %v551_v40, %v2085_v35 }
 0x2bf   :  { %v553_v42 = vsel %vm450_vm9, %v552_v41, -inf }
 0x2c0   :  { %554 = vmax.xlane.f32.xlu2 %v553_v42 }
 0x2cd   :  { %v481_v43 = vpop.xlane.xlu1 %480 }
 0x2ce   :  { %v482_v44 = vsub.f32 %v478_v37, %v481_v43 }
 0x2d0   :  { %v483_v45 = vmul.f32 1.442695, %v482_v44 }
 0x2d2   :  { %1449 = vpow2.f32 %v483_v45 }
 0x2d8   :  { %v1450_v46 = vpop.eup %1449 }
 0x2d9   :  { %v485_v47 = vsel %vm450_vm9, %v1450_v46, 0.0 }
 0x2da   :  { %486 = vadd.xlane.f32.xlu1 %v485_v47 }
 0x2f3   :  { %693 = vrot.lane.b32.xlu1 %v381_v15, %s1809_s25 }
 0x333   :  { %v555_v11 = vpop.xlane.xlu2 %554 }
 0x334   :  { %v556_v15 = vsub.f32 %v552_v41, %v555_v11 }
 0x336   :  { %v557_v18 = vmul.f32 1.442695, %v556_v15 }
 0x34d   :  { %v487_v48 = vpop.xlane.xlu1 %486 }
 0x34e   :  { %1451 = vrcp.f32 %v487_v48  ;;  %v499_v52 = vand.u32 2147483648, %v487_v48  ;;  %v497_v55 = vand.u32 2147483647, %v487_v48  ;;  %vm493_vm11 = vweird.f32 %v487_v48 }
 0x34f   :  { %1453 = vpow2.f32 %v557_v18 }
 0x350   :  { %v500_v57 = vor.u32 1.1754944e-38, %v499_v52  ;;  %vm498_vm13 = vcmp.eq.f32.partialorder %v497_v55, 8.507059e+37 }
 0x354   :  { %v1452_v49 = vpop.eup %1451 }
 0x355   :  { %v489_v50 = vmul.f32 %v1452_v49, %v487_v48  ;;  %vm494_vm10 = vweird.f32 %v1452_v49  ;;  %v2113_v30 = vpop.eup %1453 }
 0x356   :  { %vm495_vm12 = vmor %vm493_vm11, %vm494_vm10  ;;  %v559_v33 = vsel %vm450_vm9, %v2113_v30, 0.0 }
 0x357   :  { %v490_v51 = vsub.f32 1.0, %v489_v50 }
 0x359   :  { %v491_v54 = vmul.f32 %v1452_v49, %v490_v51 }
 0x35b   :  { %v492_v56 = vadd.f32 %v1452_v49, %v491_v54 }
 0x35d   :  { %v496_v58 = vsel %vm495_vm12, %v1452_v49, %v492_v56 }
 0x35e   :  { %v501_v59 = vsel %vm498_vm13, %v500_v57, %v496_v58 }
 0x35f   :  { %v502_v60 = vmul.f32 %v1450_v46, %v501_v59 }
 0x361   :  { %1387 = vmatmul.msk.f32.vlgmr.msra.gmra.mxu2 %vm450_vm9, %v502_v60 }
 0x362   :  { %1397 = vmatpush.xpose.msk.msra.mxu2 %vm450_vm9, %v772_v31 }
 0x365   :  { %v694_v62 = vpop.permute.xlu1 %693 }
 0x366   :  { %1395 = vmatmul.msk.f32.vlgmr.msra.gmra.mxu0 %vm450_vm9, %v694_v62 }
 0x367   :  { %1406 = vmatpush.xpose.msk.msra.mxu0 %vm450_vm9, %v931_v53 }
 0x369   :  { %1392 = vmatmul.msk.f32.vlgmr.msrb.gmra.mxu2 %vm450_vm9, %v607_v1 }
 0x36a   :  { %1403 = vmatpush.xpose.msk.msrb.mxu2 %vm450_vm9, %v931_v53 }
 0x36e   :  { %1401 = vmatmul.msk.f32.vlgmr.msrb.gmra.mxu0 %vm450_vm9, %v851_v3 }
 0x371   :  { %1398 = vmatmul.msk.f32.vlgmr.msra.gmra.mxu2 %vm450_vm9, %v2066_v28 }
 0x376   :  { %1407 = vmatmul.msk.f32.vlgmr.msra.gmra.mxu0 %vm450_vm9, %v1015_v4 }
 0x379   :  { %1404 = vmatmul.msk.f32.vlgmr.msrb.gmra.mxu2 %vm450_vm9, %v929_v61 }
 0x3e3   :  { %v714_v5 = vpop.f32.mrf.mxu0 }
 0x3e4   :  { %v717_v6 = vmul.f32 0.35355338, %v714_v5  ;;  %v523_v7 = vpop.f32.mrf.mxu2 }
 0x3e5   :  { %526 = vst.msk [vmem:[#allocation2] sm:$0xff] %vm450_vm9, %v523_v7 }
 0x3e6   :  { %v718_v8 = vadd.f32 %v717_v6, %v2085_v35 }
 0x3e8   :  { %v719_v9 = vsel %vm450_vm9, %v718_v8, -inf }
 0x3e9   :  { %720 = vmax.xlane.f32.xlu0 %v719_v9 }
 0x3eb   :  { %v871_v12 = vpop.f32.mrf.mxu0 }
 0x3ec   :  { %v631_v10 = vpop.f32.mrf.mxu2  ;;  %v874_v16 = vmul.f32 0.35355338, %v871_v12 }
 0x3ed   :  { %v634_v13 = vmul.f32 0.35355338, %v631_v10 }
 0x3ee   :  { %v875_v21 = vadd.f32 %v874_v16, %v2085_v35 }
 0x3ef   :  { %v635_v14 = vadd.f32 %v634_v13, %v2085_v35 }
 0x3f0   :  { %v876_v25 = vsel %vm450_vm9, %v875_v21, -inf }
 0x3f1   :  { %v636_v17 = vsel %vm450_vm9, %v635_v14, -inf }
 0x3f2   :  { %637 = vmax.xlane.f32.xlu1 %v636_v17  ;;  %v2149_v17 = vld [vmem:[#allocation21 + $0x10] sm:$0xff] }
 0x3f3   :  { %v1035_v22 = vpop.f32.mrf.mxu0 }
 0x3f4   :  { %v797_v19 = vpop.f32.mrf.mxu2  ;;  %v1038_v27 = vmul.f32 0.35355338, %v1035_v22 }
 0x3f5   :  { %v800_v20 = vmul.f32 0.35355338, %v797_v19 }
 0x3f6   :  { %v1039_v31 = vadd.f32 %v1038_v27, %v2085_v35 }
 0x3f7   :  { %v801_v24 = vadd.f32 %v800_v20, %v2085_v35 }
 0x3f8   :  { %v1040_v36 = vsel %vm450_vm9, %v1039_v31, -inf }
 0x3f9   :  { %v802_v26 = vsel %vm450_vm9, %v801_v24, -inf }
 0x3fa   :  { %877 = vmax.xlane.f32.xlu1 %v876_v25  ;;  %803 = vmax.xlane.f32.xlu2 %v802_v26 }
 0x3fc   :  { %v953_v28 = vpop.f32.mrf.mxu2 }
 0x3fd   :  { %v956_v29 = vmul.f32 0.35355338, %v953_v28 }
 0x3ff   :  { %v957_v32 = vadd.f32 %v956_v29, %v2085_v35 }
 0x401   :  { %v958_v34 = vsel %vm450_vm9, %v957_v32, -inf }
 0x402   :  { %560 = vadd.xlane.f32.xlu1 %v559_v33  ;;  %959 = vmax.xlane.f32.xlu0 %v958_v34 }
 0x403   :  { %1041 = vmax.xlane.f32.xlu2 %v1040_v36 }
 0x45c   :  { %v721_v37 = vpop.xlane.xlu0 %720 }
 0x45d   :  { %v722_v38 = vsub.f32 %v718_v8, %v721_v37 }
 0x45f   :  { %v723_v39 = vmul.f32 1.442695, %v722_v38 }
 0x461   :  { %1455 = vpow2.f32 %v723_v39 }
 0x465   :  { %v638_v40 = vpop.xlane.xlu1 %637 }
 0x466   :  { %v639_v41 = vsub.f32 %v635_v14, %v638_v40 }
 0x467   :  { %v2121_v42 = vpop.eup %1455 }
 0x468   :  { %v640_v43 = vmul.f32 1.442695, %v639_v41  ;;  %v725_v35 = vsel %vm450_vm9, %v2121_v42, 0.0 }
 0x469   :  { %726 = vadd.xlane.f32.xlu2 %v725_v35 }
 0x46a   :  { %1457 = vpow2.f32 %v640_v43 }
 0x46d   :  { %v878_v44 = vpop.xlane.xlu1 %877  ;;  %v804_v45 = vpop.xlane.xlu2 %803 }
 0x46e   :  { %v879_v46 = vsub.f32 %v875_v21, %v878_v44  ;;  %v805_v47 = vsub.f32 %v801_v24, %v804_v45 }
 0x470   :  { %v2125_v48 = vpop.eup %1457  ;;  %v880_v49 = vmul.f32 1.442695, %v879_v46  ;;  %v806_v50 = vmul.f32 1.442695, %v805_v47 }
 0x471   :  { %v642_v51 = vsel %vm450_vm9, %v2125_v48, 0.0 }
 0x472   :  { %1459 = vpow2.f32 %v880_v49  ;;  %643 = vadd.xlane.f32.xlu0 %v642_v51 }
 0x473   :  { %1461 = vpow2.f32 %v806_v50 }
 0x475   :  { %v561_v52 = vpop.xlane.xlu1 %560  ;;  %v960_v53 = vpop.xlane.xlu0 %959 }
 0x476   :  { %1463 = vrcp.f32 %v561_v52  ;;  %v1042_v54 = vpop.xlane.xlu2 %1041  ;;  %v961_v55 = vsub.f32 %v957_v32, %v960_v53  ;;  %v573_v5 = vand.u32 2147483648, %v561_v52  ;;  %v571_v8 = vand.u32 2147483647, %v561_v52 }
 0x477   :  { %v1043_v56 = vsub.f32 %v1039_v31, %v1042_v54  ;;  %vm567_vm15 = vweird.f32 %v561_v52 }
 0x478   :  { %v2129_v57 = vpop.eup %1459  ;;  %v962_v59 = vmul.f32 1.442695, %v961_v55  ;;  %v574_v13 = vor.u32 1.1754944e-38, %v573_v5  ;;  %vm572_vm2 = vcmp.eq.f32.partialorder %v571_v8, 8.507059e+37 }
 0x479   :  { %v2131_v58 = vpop.eup %1461  ;;  %v1044_v60 = vmul.f32 1.442695, %v1043_v56  ;;  %v882_v61 = vsel %vm450_vm9, %v2129_v57, 0.0 }
 0x47a   :  { %883 = vadd.xlane.f32.xlu0 %v882_v61  ;;  %v808_v62 = vsel %vm450_vm9, %v2131_v58, 0.0  ;;  %1465 = vpow2.f32 %v962_v59 }
 0x47b   :  { %809 = vadd.xlane.f32.xlu1 %v808_v62  ;;  %1467 = vpow2.f32 %v1044_v60 }
 0x47c   :  { %v1464_v1 = vpop.eup %1463 }
 0x47d   :  { %v563_v3 = vmul.f32 %v1464_v1, %v561_v52  ;;  %vm568_vm14 = vweird.f32 %v1464_v1 }
 0x47e   :  { %vm569_vm1 = vmor %vm567_vm15, %vm568_vm14 }
 0x47f   :  { %v564_v4 = vsub.f32 1.0, %v563_v3 }
 0x480   :  { %v2137_v6 = vpop.eup %1465 }
 0x481   :  { %v565_v7 = vmul.f32 %v1464_v1, %v564_v4  ;;  %v2139_v9 = vpop.eup %1467  ;;  %v964_v10 = vsel %vm450_vm9, %v2137_v6, 0.0 }
 0x482   :  { %965 = vadd.xlane.f32.xlu2 %v964_v10  ;;  %v1046_v12 = vsel %vm450_vm9, %v2139_v9, 0.0 }
 0x483   :  { %v566_v11 = vadd.f32 %v1464_v1, %v565_v7  ;;  %1047 = vadd.xlane.f32.xlu0 %v1046_v12 }
 0x485   :  { %v570_v14 = vsel %vm569_vm1, %v1464_v1, %v566_v11 }
 0x486   :  { %v575_v15 = vsel %vm572_vm2, %v574_v13, %v570_v14 }
 0x487   :  { %v576_v16 = vmul.f32 %v2113_v30, %v575_v15 }
 0x489   :  { %1390 = vmatmul.msk.f32.vlgmr.msrb.gmra.mxu1 %vm450_vm9, %v576_v16 }
 0x494   :  { %661 = vrot.lane.b32.xlu1 %v2059_v63, %s1808_s1 }
 0x49a   :  { %983 = vrot.lane.b32.xlu2 %v2149_v17, %s1808_s1 }
 0x4dc   :  { %v727_v19 = vpop.xlane.xlu2 %726 }
 0x4dd   :  { %vm733_vm6 = vweird.f32 %v727_v19  ;;  %v739_v45 = vand.u32 2147483648, %v727_v19  ;;  %v737_v46 = vand.u32 2147483647, %v727_v19 }
 0x4df   :  { %v740_v55 = vor.u32 1.1754944e-38, %v739_v45  ;;  %vm738_vm12 = vcmp.eq.f32.partialorder %v737_v46, 8.507059e+37  ;;  %v1094_v45 = vld [vmem:[%s2376_s6] sm:$0xff] }
 0x4e5   :  { %v644_v18 = vpop.xlane.xlu0 %643 }
 0x4e6   :  { %1469 = vrcp.f32 %v644_v18  ;;  %v656_v40 = vand.u32 2147483648, %v644_v18  ;;  %vm650_vm5 = vweird.f32 %v644_v18  ;;  %v654_v43 = vand.u32 2147483647, %v644_v18 }
 0x4e7   :  { %1471 = vrcp.f32 %v727_v19 }
 0x4e8   :  { %v657_v51 = vor.u32 1.1754944e-38, %v656_v40  ;;  %vm655_vm11 = vcmp.eq.f32.partialorder %v654_v43, 8.507059e+37  ;;  %v1097_v43 = vld [vmem:[%s2376_s6 + $0x18] sm:$0xff] }
 0x4e9   :  { %1116 = vmatpush.msra.mxu2 %v1097_v43  ;;  %v1272_v43 = vld [vmem:[%s2378_s8 + $0x8] sm:$0xff] }
 0x4ec   :  { %v1470_v20 = vpop.eup %1469 }
 0x4ed   :  { %v2153_v21 = vpop.xlane.xlu0 %883  ;;  %v1472_v24 = vpop.eup %1471  ;;  %v646_v25 = vmul.f32 %v1470_v20, %v644_v18  ;;  %vm651_vm3 = vweird.f32 %v1470_v20 }
 0x4ee   :  { %v2155_v22 = vpop.xlane.xlu1 %809  ;;  %v729_v63 = vmul.f32 %v1472_v24, %v727_v19  ;;  %vm734_vm4 = vweird.f32 %v1472_v24  ;;  %vm652_vm7 = vmor %vm650_vm5, %vm651_vm3  ;;  %vm890_vm1 = vweird.f32 %v2153_v21  ;;  %v896_v10 = vand.u32 2147483648, %v2153_v21 }
 0x4ef   :  { %1473 = vrcp.f32 %v2155_v22  ;;  %v647_v26 = vsub.f32 1.0, %v646_v25  ;;  %vm735_vm10 = vmor %vm733_vm6, %vm734_vm4  ;;  %vm816_vm14 = vweird.f32 %v2155_v22  ;;  %v820_v62 = vand.u32 2147483647, %v2155_v22 }
 0x4f0   :  { %1475 = vrcp.f32 %v2153_v21  ;;  %v730_v28 = vsub.f32 1.0, %v729_v63  ;;  %v822_v1 = vand.u32 2147483648, %v2155_v22  ;;  %v894_v12 = vand.u32 2147483647, %v2153_v21 }
 0x4f1   :  { %v648_v32 = vmul.f32 %v1470_v20, %v647_v26  ;;  %vm821_vm4 = vcmp.eq.f32.partialorder %v820_v62, 8.507059e+37 }
 0x4f2   :  { %v731_v34 = vmul.f32 %v1472_v24, %v730_v28  ;;  %v823_v16 = vor.u32 1.1754944e-38, %v822_v1  ;;  %vm895_vm5 = vcmp.eq.f32.partialorder %v894_v12, 8.507059e+37 }
 0x4f3   :  { %v649_v37 = vadd.f32 %v1470_v20, %v648_v32 }
 0x4f4   :  { %v732_v41 = vadd.f32 %v1472_v24, %v731_v34 }
 0x4f5   :  { %v2159_v27 = vpop.eup %1473  ;;  %v2161_v29 = vpop.xlane.xlu2 %965  ;;  %v653_v47 = vsel %vm652_vm7, %v1470_v20, %v649_v37 }
 0x4f6   :  { %v2163_v30 = vpop.eup %1475  ;;  %v2165_v31 = vpop.xlane.xlu0 %1047  ;;  %1477 = vrcp.f32 %v2161_v29  ;;  %v812_v33 = vmul.f32 %v2159_v27, %v2155_v22  ;;  %v736_v52 = vsel %vm735_vm10, %v1472_v24, %v732_v41  ;;  %v658_v56 = vsel %vm655_vm11, %v657_v51, %v653_v47 }
 0x4f7   :  { %1479 = vrcp.f32 %v2165_v31  ;;  %v886_v36 = vmul.f32 %v2163_v30, %v2153_v21  ;;  %vm817_vm13 = vweird.f32 %v2159_v27  ;;  %v741_v61 = vsel %vm738_vm12, %v740_v55, %v736_v52 }
 0x4f8   :  { %v813_v38 = vsub.f32 1.0, %v812_v33  ;;  %vm891_vm15 = vweird.f32 %v2163_v30  ;;  %v659_v8 = vmul.f32 %v2125_v48, %v658_v56  ;;  %vm2193_vm2 = vmor %vm816_vm14, %vm817_vm13  ;;  %v742_v48 = vmul.f32 %v2121_v42, %v741_v61 }
 0x4f9   :  { %v887_v35 = vsub.f32 1.0, %v886_v36  ;;  %vm2207_vm3 = vmor %vm890_vm1, %vm891_vm15  ;;  %v897_v42 = vor.u32 1.1754944e-38, %v896_v10  ;;  %vm972_vm7 = vweird.f32 %v2161_v29  ;;  %v978_v24 = vand.u32 2147483648, %v2161_v29  ;;  %v1242_v10 = vld [vmem:[%s2379_s9] sm:$0xff] }
 0x4fa   :  { %v814_v49 = vmul.f32 %v2159_v27, %v813_v38  ;;  %v976_v63 = vand.u32 2147483647, %v2161_v29  ;;  %vm1054_vm12 = vweird.f32 %v2165_v31  ;;  %v1058_v28 = vand.u32 2147483647, %v2165_v31 }
 0x4fb   :  { %v888_v53 = vmul.f32 %v2163_v30, %v887_v35  ;;  %v979_v33 = vor.u32 1.1754944e-38, %v978_v24  ;;  %vm604_vm1 = vcmask 130112   ;;  %v1096_v35 = vld [vmem:[%s2376_s6 + $0x10] sm:$0xff] }
 0x4fc   :  { %v2173_v39 = vpop.eup %1477  ;;  %v815_v59 = vadd.f32 %v2159_v27, %v814_v49  ;;  %vm977_vm14 = vcmp.eq.f32.partialorder %v976_v63, 8.507059e+37  ;;  %vm1059_vm15 = vcmp.eq.f32.partialorder %v1058_v28, 8.507059e+37  ;;  %1117 = vmatpush.msra.mxu2 %v1096_v35 }
 0x4fd   :  { %v2175_v44 = vpop.eup %1479  ;;  %v968_v50 = vmul.f32 %v2173_v39, %v2161_v29  ;;  %v889_v3 = vadd.f32 %v2163_v30, %v888_v53  ;;  %v984_v18 = vpop.permute.xlu2 %983  ;;  %vm973_vm6 = vweird.f32 %v2173_v39 }
 0x4fe   :  { %v1050_v54 = vmul.f32 %v2175_v44, %v2165_v31  ;;  %v819_v13 = vsel %vm2193_vm2, %v2159_v27, %v815_v59  ;;  %vm1055_vm10 = vweird.f32 %v2175_v44  ;;  %v1060_v27 = vand.u32 2147483648, %v2165_v31  ;;  %vm974_vm11 = vmor %vm972_vm7, %vm973_vm6 }
 0x4ff   :  { %v969_v60 = vsub.f32 1.0, %v968_v50  ;;  %v893_v19 = vsel %vm2207_vm3, %v2163_v30, %v889_v3  ;;  %v824_v21 = vsel %vm821_vm4, %v823_v16, %v819_v13  ;;  %vm1056_vm13 = vmor %vm1054_vm12, %vm1055_vm10  ;;  %vm770_vm2 = vcmask 261312   ;;  %v1245_v3 = vld [vmem:[%s2379_s9 + $0x18] sm:$0xff] }
 0x500   :  { %v1051_v4 = vsub.f32 1.0, %v1050_v54  ;;  %v825_v26 = vmul.f32 %v2131_v58, %v824_v21  ;;  %v1061_v58 = vor.u32 1.1754944e-38, %v1060_v27  ;;  %1258 = vmatpush.msrb.mxu0 %v1245_v3 }
 0x501   :  { %v970_v14 = vmul.f32 %v2173_v39, %v969_v60 }
 0x502   :  { %v1052_v20 = vmul.f32 %v2175_v44, %v1051_v4  ;;  %v1244_v4 = vld [vmem:[%s2379_s9 + $0x10] sm:$0xff] }
 0x503   :  { %v971_v22 = vadd.f32 %v2173_v39, %v970_v14  ;;  %1259 = vmatpush.msrb.mxu0 %v1244_v4 }
 0x504   :  { %v1053_v25 = vadd.f32 %v2175_v44, %v1052_v20 }
 0x505   :  { %v975_v30 = vsel %vm974_vm11, %v2173_v39, %v971_v22  ;;  %v1442_v22 = vld [vmem:[#allocation6] ss:$0 sm:$0xff] }
 0x506   :  { %v662_v5 = vpop.permute.xlu1 %661  ;;  %v597_v7 = vpop.f32.mrf.mxu1  ;;  %v1057_v34 = vsel %vm1056_vm13, %v2175_v44, %v1053_v25  ;;  %v980_v29 = vsel %vm977_vm14, %v979_v33, %v975_v30  ;;  %v1095_v44 = vld [vmem:[%s2376_s6 + $0x8] sm:$0xff]  ;;  %s1349_s6 = sshll.u32 %s2391_s21, 4  ;;  %s1350_s6 = int_to_ptr.hbm [resolvable:$true] %s1349_s6 }
 0x507   :  { %682 = vmatpush.msrb.mxu3 %v662_v5  ;;  %761 = vmatpush.msra.mxu1 %v662_v5  ;;  %v1062_v36 = vsel %vm1059_vm15, %v1061_v58, %v1057_v34  ;;  %v981_v37 = vmul.f32 %v2137_v6, %v980_v29  ;;  %v1170_v5 = vld [vmem:[%s2377_s7 + $0x8] sm:$0xff]  ;;  %v1282_v58 = vld [vmem:[%s2378_s8 + $0x58] sm:$0xff]  ;;  %v1281_v29 = vld [vmem:[%s2378_s8 + $0x50] sm:$0xff]  ;;  %vm1283_vm15 = vcmask 785408  }
 0x508   :  { %1393 = vmatmul.msk.f32.vlgmr.msrb.gmra.mxu3 %vm450_vm9, %v659_v8  ;;  %601 = vrot.lane.b32.xlu0 %v597_v7, %s1798_s2  ;;  %v1063_v31 = vmul.f32 %v2139_v9, %v1062_v36  ;;  %v1243_v7 = vld [vmem:[%s2379_s9 + $0x8] sm:$0xff]  ;;  %v1169_v8 = vld [vmem:[%s2377_s7] sm:$0xff] }
 0x509   :  { %918 = vmatpush.msrb.mxu1 %v2149_v17  ;;  %844 = vmatpush.msra.mxu3 %v2149_v17  ;;  %v898_v17 = vsel %vm895_vm5, %v897_v42, %v893_v19  ;;  %v1280_v36 = vld [vmem:[%s2378_s8 + $0x48] sm:$0xff] }
 0x50a   :  { %1396 = vmatmul.msk.f32.vlgmr.msra.gmra.mxu1 %vm450_vm9, %v742_v48  ;;  %v899_v32 = vmul.f32 %v2129_v57, %v898_v17  ;;  %1118 = vmatpush.msra.mxu2 %v1095_v44  ;;  %v1271_v44 = vld [vmem:[%s2378_s8] sm:$0xff] }
 0x50b   :  { %1004 = vmatpush.msrb.mxu3 %v984_v18  ;;  %1082 = vmatpush.msra.mxu1 %v984_v18 }
 0x50c   :  { %1119 = vmatpush.msra.mxu2 %v1094_v45  ;;  %1260 = vmatpush.msrb.mxu0 %v1243_v7 }
 0x50e   :  { %1261 = vmatpush.msrb.mxu0 %v1242_v10 }
 0x510   :  { %1399 = vmatmul.msk.f32.vlgmr.msra.gmra.mxu3 %vm450_vm9, %v825_v26 }
 0x512   :  { %1402 = vmatmul.msk.f32.vlgmr.msrb.gmra.mxu1 %vm450_vm9, %v899_v32 }
 0x513   :  { %1294 = vmatpush.msrb.mxu1 %v1282_v58 }
 0x515   :  { %1295 = vmatpush.msrb.mxu1 %v1281_v29 }
 0x517   :  { %1296 = vmatpush.msrb.mxu1 %v1280_v36 }
 0x518   :  { %1405 = vmatmul.msk.f32.vlgmr.msrb.gmra.mxu3 %vm450_vm9, %v981_v37  ;;  %v1279_v37 = vld [vmem:[%s2378_s8 + $0x40] sm:$0xff] }
 0x519   :  { %1297 = vmatpush.msrb.mxu1 %v1279_v37 }
 0x51a   :  { %1408 = vmatmul.msk.f32.vlgmr.msra.gmra.mxu1 %vm450_vm9, %v1063_v31  ;;  %v1278_v31 = vld [vmem:[%s2378_s8 + $0x38] sm:$0xff] }
 0x51b   :  { %1298 = vmatpush.msrb.mxu1 %v1278_v31 }
 0x57a   :  { %v602_v57 = vpop.permute.xlu0 %601 }
 0x57b   :  { %605 = vst.msk [vmem:[#allocation2] sm:$0xff] %vm604_vm1, %v602_v57  ;;  %v1277_v57 = vld [vmem:[%s2378_s8 + $0x30] sm:$0xff] }
 0x57c   :  { %1299 = vmatpush.msrb.mxu1 %v1277_v57 }
 0x587   :  { %v763_v38 = vpop.f32.mrf.mxu1 }
 0x588   :  { %767 = vrot.lane.b32.xlu2 %v763_v38, %s1810_s26  ;;  %v1276_v38 = vld [vmem:[%s2378_s8 + $0x28] sm:$0xff] }
 0x589   :  { %1300 = vmatpush.msrb.mxu1 %v1276_v38 }
 0x58b   :  { %v684_v39 = vpop.f32.mrf.mxu3 }
 0x58c   :  { %688 = vrot.lane.b32.xlu1 %v684_v39, %s1811_s12  ;;  %v1275_v39 = vld [vmem:[%s2378_s8 + $0x20] sm:$0xff] }
 0x58d   :  { %1301 = vmatpush.msrb.mxu1 %v1275_v39 }
 0x58f   :  { %v920_v40 = vpop.f32.mrf.mxu1 }
 0x590   :  { %924 = vrot.lane.b32.xlu0 %v920_v40, %s1798_s2  ;;  %v1274_v40 = vld [vmem:[%s2378_s8 + $0x18] sm:$0xff] }
 0x591   :  { %1302 = vmatpush.msrb.mxu1 %v1274_v40 }
 0x593   :  { %v846_v6 = vpop.f32.mrf.mxu3 }
 0x594   :  { %849 = vst.msk [vmem:[#allocation2 + $0x8] sm:$0xff] %vm450_vm9, %v846_v6  ;;  %vm691_vm9 = vcmask 195712   ;;  %v1273_v6 = vld [vmem:[%s2378_s8 + $0x10] sm:$0xff]  ;;  %s1812_s8 = smov [#allocation19]  }
 0x595   :  { %1303 = vmatpush.msrb.mxu1 %v1273_v6 }
 0x597   :  { %v1084_v41 = vpop.f32.mrf.mxu1  ;;  %1304 = vmatpush.msrb.mxu1 %v1272_v43 }
 0x598   :  { %1088 = vrot.lane.b32.xlu2 %v1084_v41, %s1810_s26 }
 0x599   :  { %1305 = vmatpush.msrb.mxu1 %v1271_v44 }
 0x59b   :  { %v1006_v9 = vpop.f32.mrf.mxu3 }
 0x59c   :  { %1010 = vrot.lane.b32.xlu1 %v1006_v9, %s1811_s12 }
 0x5e2   :  { %v768_v47 = vpop.permute.xlu2 %767 }
 0x5f2   :  { %v1089_v52 = vpop.permute.xlu2 %1088 }
 0x5fe   :  { %v689_v46 = vpop.permute.xlu1 %688 }
 0x5ff   :  { %692 = vst.msk [vmem:[#allocation2] sm:$0xff] %vm691_vm9, %v689_v46 }
 0x600   :  { %771 = vst.msk [vmem:[#allocation2] sm:$0xff] %vm770_vm2, %v768_v47 }
 0x602   :  { %v925_v49 = vpop.permute.xlu0 %924 }
 0x603   :  { %927 = vst.msk [vmem:[#allocation2 + $0x8] sm:$0xff] %vm604_vm1, %v925_v49 }
 0x607   :  { %v1092_v50 = vld [vmem:[#allocation2] sm:$0xff] }
 0x608   :  { %1409 = vmatmul.msk.f32.vlgmr.msra.gmra.mxu2 %vm208_vm0, %v1092_v50 }
 0x60e   :  { %v1011_v51 = vpop.permute.xlu1 %1010 }
 0x60f   :  { %1013 = vst.msk [vmem:[#allocation2 + $0x8] sm:$0xff] %vm691_vm9, %v1011_v51 }
 0x610   :  { %1091 = vst.msk [vmem:[#allocation2 + $0x8] sm:$0xff] %vm770_vm2, %v1089_v52 }
 0x617   :  { %v1093_v53 = vld [vmem:[#allocation2 + $0x8] sm:$0xff] }
 0x618   :  { %1410 = vmatmul.msk.f32.gmra.mxu2 %vm208_vm0, %v1093_v53 }
 0x68b   :  { %v1121_v54 = vpop.f32.mrf.mxu2 }
 0x68c   :  { %v2257_v55 = vadd.f32 %v1121_v54, %v1973_v0  ;;  %v1172_v0 = vld [vmem:[%s2377_s7 + $0x18] sm:$0xff] }
 0x68d   :  { %1191 = vmatpush.msra.mxu3 %v1172_v0 }
 0x68e   :  { %v1130_v56 = vmul.f32 %v2257_v55, %v2257_v55 }
 0x690   :  { %v1132_v59 = vsel %vm208_vm0, %v1130_v56, 0.0 }
 0x691   :  { %1133 = vadd.xlane.f32.xlu0 %v1132_v59 }
 0x69b   :  { %v1124_v60 = vpop.f32.mrf.mxu2 }
 0x69c   :  { %v2263_v61 = vadd.f32 %v1124_v60, %v1977_v2  ;;  %v1171_v2 = vld [vmem:[%s2377_s7 + $0x10] sm:$0xff]  ;;  %s1334_s7 = sshll.u32 %s1812_s8, 4  ;;  %s1335_s7 = int_to_ptr.vmem [resolvable:$true] %s1334_s7 }
 0x69d   :  { %1192 = vmatpush.msra.mxu3 %v1171_v2 }
 0x69e   :  { %v1131_v62 = vmul.f32 %v2263_v61, %v2263_v61 }
 0x69f   :  { %1193 = vmatpush.msra.mxu3 %v1170_v5 }
 0x6a0   :  { %v1135_v1 = vsel %vm208_vm0, %v1131_v62, 0.0 }
 0x6a1   :  { %1136 = vadd.xlane.f32.xlu1 %v1135_v1  ;;  %1194 = vmatpush.msra.mxu3 %v1169_v8 }
 0x704   :  { %v1134_v11 = vpop.xlane.xlu0 %1133 }
 0x705   :  { %v1138_v12 = vmul.f32 %v1134_v11, %v2016_v23 }
 0x707   :  { %v1140_v13 = vadd.f32 1e-05, %v1138_v12 }
 0x709   :  { %1481 = vrsqrt.f32 %v1140_v13  ;;  %vm1148_vm4 = vweird.f32 %v1140_v13 }
 0x70f   :  { %v1482_v14 = vpop.eup %1481 }
 0x710   :  { %v1143_v48 = vmul.f32 %v1482_v14, %v1140_v13  ;;  %vm1149_vm3 = vweird.f32 %v1482_v14 }
 0x711   :  { %vm1150_vm5 = vmor %vm1148_vm4, %vm1149_vm3 }
 0x712   :  { %v1144_v15 = vmul.f32 %v1482_v14, %v1143_v48 }
 0x714   :  { %v1145_v16 = vmul.f32 0.5, %v1144_v15  ;;  %v1137_v18 = vpop.xlane.xlu1 %1136 }
 0x715   :  { %v1139_v19 = vmul.f32 %v1137_v18, %v2016_v23 }
 0x716   :  { %v1146_v20 = vsub.f32 1.5, %v1145_v16 }
 0x717   :  { %v1141_v42 = vadd.f32 1e-05, %v1139_v19 }
 0x718   :  { %v1147_v21 = vmul.f32 %v1482_v14, %v1146_v20 }
 0x719   :  { %1483 = vrsqrt.f32 %v1141_v42  ;;  %vm1158_vm7 = vweird.f32 %v1141_v42 }
 0x71a   :  { %v1151_v17 = vsel %vm1150_vm5, %v1482_v14, %v1147_v21  ;;  %v426_v21 = vld [vmem:[#allocation17 + $0x8] sm:$0xff] }
 0x71b   :  { %v1162_v24 = vmul.f32 %v1151_v17, %v2257_v55  ;;  %430 = vst.msk [vmem:[#allocation19 + $0x8] sm:$0xff] %vm389_vm8, %v426_v21  ;;  %v434_v17 = vld [vmem:[%s2388_s18 + $0x8] sm:$0xff] }
 0x71c   :  { %438 = vst.msk [vmem:[#allocation21 + $0x8] sm:$0xff] %vm389_vm8, %v434_v17 }
 0x71d   :  { %v1167_v25 = vmul.f32 %v1442_v22, %v1162_v24  ;;  %v436_v24 = vld [vmem:[%s2388_s18 + $0x18] sm:$0xff]  ;;  %s1814_s18 = smov [#allocation18]  }
 0x71e   :  { %440 = vst.msk [vmem:[#allocation21 + $0x18] sm:$0xff] %vm389_vm8, %v436_v24  ;;  %s1321_s20 = sshll.u32 %s1814_s18, 4  ;;  %s1322_s20 = int_to_ptr.vmem [resolvable:$true] %s1321_s20 }
 0x71f   :  { %v1484_v63 = vpop.eup %1483  ;;  %1411 = vmatmul.msk.f32.vlgmr.msra.gmra.mxu3 %vm208_vm0, %v1167_v25  ;;  %1413 = vmatmul.msk.f32.vlgmr.msrb.gmra.mxu0 %vm208_vm0, %v1167_v25 }
 0x720   :  { %v1153_v26 = vmul.f32 %v1484_v63, %v1141_v42  ;;  %vm1159_vm6 = vweird.f32 %v1484_v63 }
 0x721   :  { %vm1160_vm10 = vmor %vm1158_vm7, %vm1159_vm6 }
 0x722   :  { %v1154_v27 = vmul.f32 %v1484_v63, %v1153_v26 }
 0x724   :  { %v1155_v23 = vmul.f32 0.5, %v1154_v27 }
 0x726   :  { %v1156_v28 = vsub.f32 1.5, %v1155_v23 }
 0x728   :  { %v1157_v30 = vmul.f32 %v1484_v63, %v1156_v28 }
 0x72a   :  { %v1161_v32 = vsel %vm1160_vm10, %v1484_v63, %v1157_v30 }
 0x72b   :  { %v1163_v33 = vmul.f32 %v1161_v32, %v2263_v61 }
 0x72d   :  { %v1168_v34 = vmul.f32 %v1442_v22, %v1163_v33  ;;  %v428_v22 = vld [vmem:[#allocation17 + $0x18] sm:$0xff] }
 0x72e   :  { %432 = vst.msk [vmem:[#allocation19 + $0x18] sm:$0xff] %vm389_vm8, %v428_v22 }
 0x72f   :  { %1412 = vmatmul.msk.f32.gmra.mxu3 %vm208_vm0, %v1168_v34  ;;  %1414 = vmatmul.msk.f32.gmra.mxu0 %vm208_vm0, %v1168_v34  ;;  %1342 = dma.vmem_to_hbm [thread:$0]  %s1335_s7, 512, %s1337_s27, [#allocation20], %s1797_s24, %s1797_s24, %s1798_s2  }
 0x730   :  { %1355 = dma.vmem_to_hbm [thread:$0]  %s1348_s29, 512, %s1350_s6, [#allocation20], %s1797_s24, %s1797_s24, %s1798_s2  }
 0x79c   :  { %v1263_v5 = vpop.f32.mrf.mxu0 }
 0x7a2   :  { %v1196_v41 = vpop.f32.mrf.mxu3 }
 0x7a3   :  { %v1202_v9 = vsub.f32 0.0, %v1196_v41 }
 0x7a5   :  { %v1204_v35 = vmul.f32 1.442695, %v1202_v9 }
 0x7a7   :  { %1485 = vpow2.f32 %v1204_v35 }
 0x7ac   :  { %v1266_v20 = vpop.f32.mrf.mxu0 }
 0x7ad   :  { %v1486_v45 = vpop.eup %1485 }
 0x7ae   :  { %v1208_v46 = vadd.f32 1.0, %v1486_v45 }
 0x7b0   :  { %1487 = vrcp.f32 %v1208_v46  ;;  %v1221_v54 = vand.u32 2147483648, %v1208_v46  ;;  %v1219_v59 = vand.u32 2147483647, %v1208_v46  ;;  %vm1215_vm12 = vweird.f32 %v1208_v46 }
 0x7b2   :  { %v1199_v47 = vpop.f32.mrf.mxu3  ;;  %v1222_v1 = vor.u32 1.1754944e-38, %v1221_v54  ;;  %vm1220_vm14 = vcmp.eq.f32.partialorder %v1219_v59, 8.507059e+37 }
 0x7b3   :  { %v1203_v49 = vsub.f32 0.0, %v1199_v47 }
 0x7b5   :  { %v1206_v50 = vmul.f32 1.442695, %v1203_v49 }
 0x7b6   :  { %v1488_v51 = vpop.eup %1487 }
 0x7b7   :  { %v1211_v52 = vmul.f32 %v1488_v51, %v1208_v46  ;;  %1489 = vpow2.f32 %v1206_v50  ;;  %vm1216_vm11 = vweird.f32 %v1488_v51 }
 0x7b8   :  { %vm1217_vm13 = vmor %vm1215_vm12, %vm1216_vm11 }
 0x7b9   :  { %v1212_v53 = vsub.f32 1.0, %v1211_v52 }
 0x7bb   :  { %v1213_v56 = vmul.f32 %v1488_v51, %v1212_v53 }
 0x7bd   :  { %v1490_v60 = vpop.eup %1489  ;;  %v1214_v62 = vadd.f32 %v1488_v51, %v1213_v56 }
 0x7be   :  { %v1209_v0 = vadd.f32 1.0, %v1490_v60 }
 0x7bf   :  { %v1218_v3 = vsel %vm1217_vm13, %v1488_v51, %v1214_v62 }
 0x7c0   :  { %v1223_v2 = vsel %vm1220_vm14, %v1222_v1, %v1218_v3  ;;  %1491 = vrcp.f32 %v1209_v0  ;;  %v1236_v12 = vand.u32 2147483648, %v1209_v0  ;;  %v1234_v14 = vand.u32 2147483647, %v1209_v0 }
 0x7c1   :  { %v1240_v4 = vmul.f32 %v1223_v2, %v1196_v41  ;;  %vm1230_vm9 = vweird.f32 %v1209_v0 }
 0x7c2   :  { %v1237_v15 = vor.u32 1.1754944e-38, %v1236_v12  ;;  %vm1235_vm3 = vcmp.eq.f32.partialorder %v1234_v14, 8.507059e+37 }
 0x7c3   :  { %v1269_v7 = vmul.f32 %v1263_v5, %v1240_v4 }
 0x7c5   :  { %1415 = vmatmul.msk.f32.vlgmr.msrb.gmra.mxu1 %vm1283_vm15, %v1269_v7 }
 0x7c6   :  { %v1492_v8 = vpop.eup %1491 }
 0x7c7   :  { %v1226_v10 = vmul.f32 %v1492_v8, %v1209_v0  ;;  %vm1231_vm1 = vweird.f32 %v1492_v8 }
 0x7c8   :  { %vm1232_vm2 = vmor %vm1230_vm9, %vm1231_vm1 }
 0x7c9   :  { %v1227_v11 = vsub.f32 1.0, %v1226_v10 }
 0x7cb   :  { %v1228_v13 = vmul.f32 %v1492_v8, %v1227_v11 }
 0x7cd   :  { %v1229_v48 = vadd.f32 %v1492_v8, %v1228_v13 }
 0x7cf   :  { %v1233_v16 = vsel %vm1232_vm2, %v1492_v8, %v1229_v48 }
 0x7d0   :  { %v1238_v18 = vsel %vm1235_vm3, %v1237_v15, %v1233_v16 }
 0x7d1   :  { %v1241_v19 = vmul.f32 %v1238_v18, %v1199_v47 }
 0x7d3   :  { %v1270_v42 = vmul.f32 %v1266_v20, %v1241_v19 }
 0x7d5   :  { %1416 = vmatmul.msk.f32.gmra.mxu1 %vm1283_vm15, %v1270_v42 }
 0x842   :  { %v1307_v25 = vpop.f32.mrf.mxu1 }
 0x843   :  { %v1313_v63 = vadd.f32 %v1307_v25, %v2257_v55 }
 0x845   :  { %1315 = vst.msk [vmem:[#allocation18] sm:$0xff] %vm208_vm0, %v1313_v63 }
 0x852   :  { %v1310_v26 = vpop.f32.mrf.mxu1 }
 0x853   :  { %v1314_v27 = vadd.f32 %v1310_v26, %v2263_v61 }
 0x855   :  { %1316 = vst.msk [vmem:[#allocation18 + $0x8] sm:$0xff] %vm208_vm0, %v1314_v27 }
 0x856   :  { %1329 = dma.vmem_to_hbm [thread:$0]  %s1322_s20, 256, %s1324_s16, [#allocation5], %s1797_s24, %s1797_s24, %s1798_s2  }
 0x857   :  { %1791 = dma.done.wait [#allocation5], 256  }
 0x858   :  { %1792 = vsyncadd [#allocation5], 4294967040 }
 0x859   :  { %1793 = dma.done.wait [#allocation20], 1024  }
 0x85a   :  { %1794 = vsyncadd [#allocation20], 4294966272 }
 0x85b   :  { %1368 = vsyncpa [#allocation4], 1 }
 0x85c   :  { %1369 = vsyncpa [#allocation7], 1 }
 0x85d   :  { %1370 = vsyncpa [#allocation10], 1 }
 0x85e   :  { %1371 = vsyncpa [#allocation13], 1 }
 0x85f   :  { %1372 = vsyncpa [#allocation16], 1 }
 0x860   :  { %1373 = vsyncpa [#allocation5], 1 }
 0x861   :  { %1374 = vsyncpa [#allocation20], 1 }

</bundles_post_ra>
